<compile_context>
chip_gen: v7x
topology: tpu7x:2x2x1
jax: 0.10.0
libtpu: 0.0.40
codegen_flags: <defaults>
</compile_context>

<pallas_src>
import functools

import numpy as np
import jax
import jax.numpy as jnp
from jax.experimental import pallas as pl
from jax.experimental.pallas import tpu as pltpu


# ----------------------------------------------------------------------------
# Parameter construction / training-mode projection (pure JAX, not hot path)
# ----------------------------------------------------------------------------
def init_pair_Y(num_pairs: int, grid_width: int) -> jax.Array:
    """Matches PairBilinear.__init__: identity lookup tables."""
    lin = jnp.linspace(0.0, 1.0, grid_width, dtype=jnp.float32)
    row = jnp.broadcast_to(lin[:, None], (grid_width, grid_width))  # [i,j] = i/(W-1)
    col = jnp.broadcast_to(lin[None, :], (grid_width, grid_width))  # [i,j] = j/(W-1)
    Y = jnp.stack([row, col], axis=0)                               # (2, W, W)
    return jnp.broadcast_to(
        Y[None], (num_pairs, 2, grid_width, grid_width)
    ).astype(jnp.float32)


def project_Y(Y: jax.Array, dy: float) -> jax.Array:
    """Training-mode re-projection of Y (the `if self.training:` branch)."""
    init0 = Y[:, :, :, :1]
    init1 = Y[:, :, :1, :]
    a0 = jnp.clip(jnp.diff(Y, axis=-1), -dy, dy)
    a1 = jnp.clip(jnp.diff(Y, axis=-2), -dy, dy)
    a0 = jnp.concatenate([init0, a0], axis=-1)
    a1 = jnp.concatenate([init1, a1], axis=-2)
    f0 = jnp.cumsum(a0, axis=-1)
    f1 = jnp.cumsum(a1, axis=-2)
    return (f0 + f1) / 2


# ----------------------------------------------------------------------------
# Pallas kernel
# ----------------------------------------------------------------------------
def _pair_bilinear_kernel(x0_ref, x1_ref, y0_ref, y1_ref, o0_ref, o1_ref, *, W):
    wm1 = float(W - 1)
    # Grid coordinates, clamped to the table. Shapes (TB, TP): batch x pairs.
    u = jnp.clip(x0_ref[...].astype(jnp.float32) * wm1, 0.0, wm1)
    v = jnp.clip(x1_ref[...].astype(jnp.float32) * wm1, 0.0, wm1)

    # Column (j) tent weights, hoisted once: wc[j][b,p] = max(0, 1 - |v - j|).
    # Exactly the bilinear column weights for the clamped coordinate v.
    wc = [jnp.maximum(0.0, 1.0 - jnp.abs(v - float(j))) for j in range(W)]

    acc0 = jnp.zeros_like(u)
    acc1 = jnp.zeros_like(u)
    # Static unroll over the (small) WxW grid; all ops are lane-dense 2-D VPU
    # FMAs, Y rows are (TP,) lane vectors broadcast across the batch sublanes.
    for i in range(W):
        wr = jnp.maximum(0.0, 1.0 - jnp.abs(u - float(i)))  # row tent weight
        s0 = jnp.zeros_like(u)
        s1 = jnp.zeros_like(u)
        for j in range(W):
            row = i * W + j
            s0 = s0 + wc[j] * y0_ref[row]
            s1 = s1 + wc[j] * y1_ref[row]
        acc0 = acc0 + wr * s0
        acc1 = acc1 + wr * s1

    o0_ref[...] = acc0.astype(o0_ref.dtype)
    o1_ref[...] = acc1.astype(o1_ref.dtype)


def _pick_tile(n: int, max_tile: int, align: int) -> int:
    """Largest aligned tile <= max_tile that divides n, else the full dim."""
    if n <= max_tile:
        return n
    t = (max_tile // align) * align
    while t >= align:
        if n % t == 0:
            return t
        t -= align
    return n


def pair_bilinear(x: jax.Array, Y: jax.Array, *, batch_tile: int = 128,
                  pair_tile: int = 512) -> jax.Array:
    """Forward pass of PairBilinear (eval mode) via a Pallas TPU kernel."""
    B, D = x.shape
    P, C, W, W2 = Y.shape
    assert C == 2 and W == W2 and D == 2 * P, "shape mismatch"

    # Wrapper-side layout plumbing (plain XLA): split pairs, pairs -> lanes.
    xp = x.reshape(B, P, 2)
    x0 = xp[..., 0]                                   # (B, P)
    x1 = xp[..., 1]                                   # (B, P)
    Yt = jnp.transpose(Y, (1, 2, 3, 0)).reshape(2, W * W, P)
    y0 = Yt[0]                                        # (W*W, P), row = i*W + j
    y1 = Yt[1]

    TB = _pick_tile(B, batch_tile, 8)
    TP = _pick_tile(P, pair_tile, 128)
    grid = (B // TB, P // TP)

    kernel = functools.partial(_pair_bilinear_kernel, W=W)

    out0, out1 = pl.pallas_call(
        kernel,
        out_shape=(jax.ShapeDtypeStruct((B, P), x.dtype),
                   jax.ShapeDtypeStruct((B, P), x.dtype)),
        grid=grid,
        in_specs=[
            pl.BlockSpec((TB, TP), lambda b, p: (b, p)),      # x0
            pl.BlockSpec((TB, TP), lambda b, p: (b, p)),      # x1
            pl.BlockSpec((W * W, TP), lambda b, p: (0, p)),   # Y chan 0 (resident)
            pl.BlockSpec((W * W, TP), lambda b, p: (0, p)),   # Y chan 1 (resident)
        ],
        out_specs=(
            pl.BlockSpec((TB, TP), lambda b, p: (b, p)),
            pl.BlockSpec((TB, TP), lambda b, p: (b, p)),
        ),
        compiler_params=pltpu.CompilerParams(
            dimension_semantics=("parallel", "parallel")),
    )(x0, x1, y0, y1)

    # Interleave channels back: out[:, 2p] = chan0, out[:, 2p+1] = chan1.
    return jnp.stack([out0, out1], axis=-1).reshape(B, D)


# ----------------------------------------------------------------------------
# Pure-JAX reference (explicit floor + 4-point gather formulation)
# ----------------------------------------------------------------------------
def pair_bilinear_ref(x: jax.Array, Y: jax.Array) -> jax.Array:
    B, D = x.shape
    P, _, W, _ = Y.shape
    xp = x.reshape(B, P, 2)
    wm1 = float(W - 1)
    u = jnp.clip(xp[..., 0] * wm1, 0.0, wm1)
    v = jnp.clip(xp[..., 1] * wm1, 0.0, wm1)
    i0 = jnp.clip(jnp.floor(u), 0, W - 2).astype(jnp.int32)
    j0 = jnp.clip(jnp.floor(v), 0, W - 2).astype(jnp.int32)
    fu = (u - i0)[..., None]
    fv = (v - j0)[..., None]
    pp = jnp.arange(P)[None, :, None]
    cc = jnp.arange(2)[None, None, :]

    def g(ii, jj):
        return Y[pp, cc, ii[..., None], jj[..., None]]    # (B, P, 2)

    out = (g(i0, j0) * (1 - fu) * (1 - fv)
           + g(i0, j0 + 1) * (1 - fu) * fv
           + g(i0 + 1, j0) * fu * (1 - fv)
           + g(i0 + 1, j0 + 1) * fu * fv)
    return out.reshape(B, D)


# ----------------------------------------------------------------------------
if __name__ == "__main__":
    B, dim, grid_width = 32, 32, 8          # small shapes; P = 16 pairs
    P = dim // 2
    dy = 2.0 / (grid_width - 1)

    key = jax.random.PRNGKey(0)
    kx, ky = jax.random.split(key)
    x = jax.random.uniform(kx, (B, dim), dtype=jnp.float32)   # coords in [0,1)

    # 1) Identity check with the freshly initialized tables (as in __init__).
    Y_init = init_pair_Y(P, grid_width)
    out_id = jax.block_until_ready(pair_bilinear(x, Y_init, batch_tile=8))
    assert out_id.shape == (B, dim)
    np.testing.assert_allclose(np.asarray(out_id), np.asarray(x),
                               rtol=0, atol=1e-5)

    # 2) Non-trivial tables: perturb, apply the training-mode projection
    #    (pure JAX), then compare kernel vs. reference bilinear lookup.
    Y = Y_init + 0.05 * jax.random.normal(ky, Y_init.shape, dtype=jnp.float32)
    Y = project_Y(Y, dy)
    out = jax.block_until_ready(pair_bilinear(x, Y, batch_tile=8))
    ref = pair_bilinear_ref(x, Y)
    np.testing.assert_allclose(np.asarray(out), np.asarray(ref),
                               rtol=1e-5, atol=1e-5)

    print("KERNEL_OK")
</pallas_src>

<mosaic_0001>
module attributes {stable_mosaic.version = 11 : i64} {
  func.func @_pair_bilinear_kernel(%arg0: i32, %arg1: i32, %arg2: memref<8x16xf32, #tpu.memory_space<vmem>>, %arg3: memref<8x16xf32, #tpu.memory_space<vmem>>, %arg4: memref<64x16xf32, #tpu.memory_space<vmem>>, %arg5: memref<64x16xf32, #tpu.memory_space<vmem>>, %arg6: memref<8x16xf32, #tpu.memory_space<vmem>>, %arg7: memref<8x16xf32, #tpu.memory_space<vmem>>) attributes {dimension_semantics = [#tpu.dimension_semantics<parallel>, #tpu.dimension_semantics<parallel>], iteration_bounds = array<i64: 4, 1>, scalar_prefetch = 0 : i64, scratch_operands = 0 : i64, tpu.core_type = #tpu.core_type<tc>, window_params = [{transform_indices = @transform_0, window_bounds = array<i64: 8, 16>}, {transform_indices = @transform_1, window_bounds = array<i64: 8, 16>}, {transform_indices = @transform_2, window_bounds = array<i64: 64, 16>}, {transform_indices = @transform_3, window_bounds = array<i64: 64, 16>}, {transform_indices = @transform_4, window_bounds = array<i64: 8, 16>}, {transform_indices = @transform_5, window_bounds = array<i64: 8, 16>}]} {
    %c0 = arith.constant 0 : index
    %c0_0 = arith.constant 0 : index
    %0 = vector.load %arg2[%c0, %c0_0] : memref<8x16xf32, #tpu.memory_space<vmem>>, vector<8x16xf32>
    %cst = arith.constant 7.000000e+00 : f32
    %1 = vector.broadcast %cst : f32 to vector<8x16xf32>
    %2 = arith.mulf %0, %1 : vector<8x16xf32>
    %cst_1 = arith.constant 0.000000e+00 : f32
    %cst_2 = arith.constant 7.000000e+00 : f32
    %3 = vector.broadcast %cst_1 : f32 to vector<8x16xf32>
    %4 = arith.maximumf %3, %2 : vector<8x16xf32>
    %5 = vector.broadcast %cst_2 : f32 to vector<8x16xf32>
    %6 = arith.minimumf %5, %4 : vector<8x16xf32>
    %c0_3 = arith.constant 0 : index
    %c0_4 = arith.constant 0 : index
    %7 = vector.load %arg3[%c0_3, %c0_4] : memref<8x16xf32, #tpu.memory_space<vmem>>, vector<8x16xf32>
    %cst_5 = arith.constant 7.000000e+00 : f32
    %8 = vector.broadcast %cst_5 : f32 to vector<8x16xf32>
    %9 = arith.mulf %7, %8 : vector<8x16xf32>
    %cst_6 = arith.constant 0.000000e+00 : f32
    %cst_7 = arith.constant 7.000000e+00 : f32
    %10 = vector.broadcast %cst_6 : f32 to vector<8x16xf32>
    %11 = arith.maximumf %10, %9 : vector<8x16xf32>
    %12 = vector.broadcast %cst_7 : f32 to vector<8x16xf32>
    %13 = arith.minimumf %12, %11 : vector<8x16xf32>
    %cst_8 = arith.constant 0.000000e+00 : f32
    %14 = vector.broadcast %cst_8 : f32 to vector<8x16xf32>
    %15 = arith.subf %13, %14 : vector<8x16xf32>
    %16 = math.absf %15 : vector<8x16xf32>
    %cst_9 = arith.constant 1.000000e+00 : f32
    %17 = vector.broadcast %cst_9 : f32 to vector<8x16xf32>
    %18 = arith.subf %17, %16 : vector<8x16xf32>
    %cst_10 = arith.constant 0.000000e+00 : f32
    %19 = vector.broadcast %cst_10 : f32 to vector<8x16xf32>
    %20 = arith.maximumf %19, %18 : vector<8x16xf32>
    %cst_11 = arith.constant 1.000000e+00 : f32
    %21 = vector.broadcast %cst_11 : f32 to vector<8x16xf32>
    %22 = arith.subf %13, %21 : vector<8x16xf32>
    %23 = math.absf %22 : vector<8x16xf32>
    %cst_12 = arith.constant 1.000000e+00 : f32
    %24 = vector.broadcast %cst_12 : f32 to vector<8x16xf32>
    %25 = arith.subf %24, %23 : vector<8x16xf32>
    %cst_13 = arith.constant 0.000000e+00 : f32
    %26 = vector.broadcast %cst_13 : f32 to vector<8x16xf32>
    %27 = arith.maximumf %26, %25 : vector<8x16xf32>
    %cst_14 = arith.constant 2.000000e+00 : f32
    %28 = vector.broadcast %cst_14 : f32 to vector<8x16xf32>
    %29 = arith.subf %13, %28 : vector<8x16xf32>
    %30 = math.absf %29 : vector<8x16xf32>
    %cst_15 = arith.constant 1.000000e+00 : f32
    %31 = vector.broadcast %cst_15 : f32 to vector<8x16xf32>
    %32 = arith.subf %31, %30 : vector<8x16xf32>
    %cst_16 = arith.constant 0.000000e+00 : f32
    %33 = vector.broadcast %cst_16 : f32 to vector<8x16xf32>
    %34 = arith.maximumf %33, %32 : vector<8x16xf32>
    %cst_17 = arith.constant 3.000000e+00 : f32
    %35 = vector.broadcast %cst_17 : f32 to vector<8x16xf32>
    %36 = arith.subf %13, %35 : vector<8x16xf32>
    %37 = math.absf %36 : vector<8x16xf32>
    %cst_18 = arith.constant 1.000000e+00 : f32
    %38 = vector.broadcast %cst_18 : f32 to vector<8x16xf32>
    %39 = arith.subf %38, %37 : vector<8x16xf32>
    %cst_19 = arith.constant 0.000000e+00 : f32
    %40 = vector.broadcast %cst_19 : f32 to vector<8x16xf32>
    %41 = arith.maximumf %40, %39 : vector<8x16xf32>
    %cst_20 = arith.constant 4.000000e+00 : f32
    %42 = vector.broadcast %cst_20 : f32 to vector<8x16xf32>
    %43 = arith.subf %13, %42 : vector<8x16xf32>
    %44 = math.absf %43 : vector<8x16xf32>
    %cst_21 = arith.constant 1.000000e+00 : f32
    %45 = vector.broadcast %cst_21 : f32 to vector<8x16xf32>
    %46 = arith.subf %45, %44 : vector<8x16xf32>
    %cst_22 = arith.constant 0.000000e+00 : f32
    %47 = vector.broadcast %cst_22 : f32 to vector<8x16xf32>
    %48 = arith.maximumf %47, %46 : vector<8x16xf32>
    %cst_23 = arith.constant 5.000000e+00 : f32
    %49 = vector.broadcast %cst_23 : f32 to vector<8x16xf32>
    %50 = arith.subf %13, %49 : vector<8x16xf32>
    %51 = math.absf %50 : vector<8x16xf32>
    %cst_24 = arith.constant 1.000000e+00 : f32
    %52 = vector.broadcast %cst_24 : f32 to vector<8x16xf32>
    %53 = arith.subf %52, %51 : vector<8x16xf32>
    %cst_25 = arith.constant 0.000000e+00 : f32
    %54 = vector.broadcast %cst_25 : f32 to vector<8x16xf32>
    %55 = arith.maximumf %54, %53 : vector<8x16xf32>
    %cst_26 = arith.constant 6.000000e+00 : f32
    %56 = vector.broadcast %cst_26 : f32 to vector<8x16xf32>
    %57 = arith.subf %13, %56 : vector<8x16xf32>
    %58 = math.absf %57 : vector<8x16xf32>
    %cst_27 = arith.constant 1.000000e+00 : f32
    %59 = vector.broadcast %cst_27 : f32 to vector<8x16xf32>
    %60 = arith.subf %59, %58 : vector<8x16xf32>
    %cst_28 = arith.constant 0.000000e+00 : f32
    %61 = vector.broadcast %cst_28 : f32 to vector<8x16xf32>
    %62 = arith.maximumf %61, %60 : vector<8x16xf32>
    %cst_29 = arith.constant 7.000000e+00 : f32
    %63 = vector.broadcast %cst_29 : f32 to vector<8x16xf32>
    %64 = arith.subf %13, %63 : vector<8x16xf32>
    %65 = math.absf %64 : vector<8x16xf32>
    %cst_30 = arith.constant 1.000000e+00 : f32
    %66 = vector.broadcast %cst_30 : f32 to vector<8x16xf32>
    %67 = arith.subf %66, %65 : vector<8x16xf32>
    %cst_31 = arith.constant 0.000000e+00 : f32
    %68 = vector.broadcast %cst_31 : f32 to vector<8x16xf32>
    %69 = arith.maximumf %68, %67 : vector<8x16xf32>
    %cst_32 = arith.constant 0.000000e+00 : f32
    %70 = vector.broadcast %cst_32 : f32 to vector<8x16xf32>
    %cst_33 = arith.constant 0.000000e+00 : f32
    %71 = vector.broadcast %cst_33 : f32 to vector<8x16xf32>
    %cst_34 = arith.constant 0.000000e+00 : f32
    %72 = vector.broadcast %cst_34 : f32 to vector<8x16xf32>
    %73 = arith.subf %6, %72 : vector<8x16xf32>
    %74 = math.absf %73 : vector<8x16xf32>
    %cst_35 = arith.constant 1.000000e+00 : f32
    %75 = vector.broadcast %cst_35 : f32 to vector<8x16xf32>
    %76 = arith.subf %75, %74 : vector<8x16xf32>
    %cst_36 = arith.constant 0.000000e+00 : f32
    %77 = vector.broadcast %cst_36 : f32 to vector<8x16xf32>
    %78 = arith.maximumf %77, %76 : vector<8x16xf32>
    %cst_37 = arith.constant 0.000000e+00 : f32
    %79 = vector.broadcast %cst_37 : f32 to vector<8x16xf32>
    %cst_38 = arith.constant 0.000000e+00 : f32
    %80 = vector.broadcast %cst_38 : f32 to vector<8x16xf32>
    %c0_39 = arith.constant 0 : index
    %c0_40 = arith.constant 0 : index
    %81 = vector.load %arg4[%c0_39, %c0_40] : memref<64x16xf32, #tpu.memory_space<vmem>>, vector<1x16xf32>
    %82 = vector.shape_cast %81 : vector<1x16xf32> to vector<16xf32>
    %83 = vector.shape_cast %82 : vector<16xf32> to vector<1x16xf32>
    %84 = vector.broadcast %83 : vector<1x16xf32> to vector<8x16xf32>
    %85 = arith.mulf %20, %84 : vector<8x16xf32>
    %86 = arith.addf %79, %85 : vector<8x16xf32>
    %c0_41 = arith.constant 0 : index
    %c0_42 = arith.constant 0 : index
    %87 = vector.load %arg5[%c0_41, %c0_42] : memref<64x16xf32, #tpu.memory_space<vmem>>, vector<1x16xf32>
    %88 = vector.shape_cast %87 : vector<1x16xf32> to vector<16xf32>
    %89 = vector.shape_cast %88 : vector<16xf32> to vector<1x16xf32>
    %90 = vector.broadcast %89 : vector<1x16xf32> to vector<8x16xf32>
    %91 = arith.mulf %20, %90 : vector<8x16xf32>
    %92 = arith.addf %80, %91 : vector<8x16xf32>
    %c1 = arith.constant 1 : index
    %c0_43 = arith.constant 0 : index
    %93 = vector.load %arg4[%c1, %c0_43] : memref<64x16xf32, #tpu.memory_space<vmem>>, vector<1x16xf32>
    %94 = vector.shape_cast %93 : vector<1x16xf32> to vector<16xf32>
    %95 = vector.shape_cast %94 : vector<16xf32> to vector<1x16xf32>
    %96 = vector.broadcast %95 : vector<1x16xf32> to vector<8x16xf32>
    %97 = arith.mulf %27, %96 : vector<8x16xf32>
    %98 = arith.addf %86, %97 : vector<8x16xf32>
    %c1_44 = arith.constant 1 : index
    %c0_45 = arith.constant 0 : index
    %99 = vector.load %arg5[%c1_44, %c0_45] : memref<64x16xf32, #tpu.memory_space<vmem>>, vector<1x16xf32>
    %100 = vector.shape_cast %99 : vector<1x16xf32> to vector<16xf32>
    %101 = vector.shape_cast %100 : vector<16xf32> to vector<1x16xf32>
    %102 = vector.broadcast %101 : vector<1x16xf32> to vector<8x16xf32>
    %103 = arith.mulf %27, %102 : vector<8x16xf32>
    %104 = arith.addf %92, %103 : vector<8x16xf32>
    %c2 = arith.constant 2 : index
    %c0_46 = arith.constant 0 : index
    %105 = vector.load %arg4[%c2, %c0_46] : memref<64x16xf32, #tpu.memory_space<vmem>>, vector<1x16xf32>
    %106 = vector.shape_cast %105 : vector<1x16xf32> to vector<16xf32>
    %107 = vector.shape_cast %106 : vector<16xf32> to vector<1x16xf32>
    %108 = vector.broadcast %107 : vector<1x16xf32> to vector<8x16xf32>
    %109 = arith.mulf %34, %108 : vector<8x16xf32>
    %110 = arith.addf %98, %109 : vector<8x16xf32>
    %c2_47 = arith.constant 2 : index
    %c0_48 = arith.constant 0 : index
    %111 = vector.load %arg5[%c2_47, %c0_48] : memref<64x16xf32, #tpu.memory_space<vmem>>, vector<1x16xf32>
    %112 = vector.shape_cast %111 : vector<1x16xf32> to vector<16xf32>
    %113 = vector.shape_cast %112 : vector<16xf32> to vector<1x16xf32>
    %114 = vector.broadcast %113 : vector<1x16xf32> to vector<8x16xf32>
    %115 = arith.mulf %34, %114 : vector<8x16xf32>
    %116 = arith.addf %104, %115 : vector<8x16xf32>
    %c3 = arith.constant 3 : index
    %c0_49 = arith.constant 0 : index
    %117 = vector.load %arg4[%c3, %c0_49] : memref<64x16xf32, #tpu.memory_space<vmem>>, vector<1x16xf32>
    %118 = vector.shape_cast %117 : vector<1x16xf32> to vector<16xf32>
    %119 = vector.shape_cast %118 : vector<16xf32> to vector<1x16xf32>
    %120 = vector.broadcast %119 : vector<1x16xf32> to vector<8x16xf32>
    %121 = arith.mulf %41, %120 : vector<8x16xf32>
    %122 = arith.addf %110, %121 : vector<8x16xf32>
    %c3_50 = arith.constant 3 : index
    %c0_51 = arith.constant 0 : index
    %123 = vector.load %arg5[%c3_50, %c0_51] : memref<64x16xf32, #tpu.memory_space<vmem>>, vector<1x16xf32>
    %124 = vector.shape_cast %123 : vector<1x16xf32> to vector<16xf32>
    %125 = vector.shape_cast %124 : vector<16xf32> to vector<1x16xf32>
    %126 = vector.broadcast %125 : vector<1x16xf32> to vector<8x16xf32>
    %127 = arith.mulf %41, %126 : vector<8x16xf32>
    %128 = arith.addf %116, %127 : vector<8x16xf32>
    %c4 = arith.constant 4 : index
    %c0_52 = arith.constant 0 : index
    %129 = vector.load %arg4[%c4, %c0_52] : memref<64x16xf32, #tpu.memory_space<vmem>>, vector<1x16xf32>
    %130 = vector.shape_cast %129 : vector<1x16xf32> to vector<16xf32>
    %131 = vector.shape_cast %130 : vector<16xf32> to vector<1x16xf32>
    %132 = vector.broadcast %131 : vector<1x16xf32> to vector<8x16xf32>
    %133 = arith.mulf %48, %132 : vector<8x16xf32>
    %134 = arith.addf %122, %133 : vector<8x16xf32>
    %c4_53 = arith.constant 4 : index
    %c0_54 = arith.constant 0 : index
    %135 = vector.load %arg5[%c4_53, %c0_54] : memref<64x16xf32, #tpu.memory_space<vmem>>, vector<1x16xf32>
    %136 = vector.shape_cast %135 : vector<1x16xf32> to vector<16xf32>
    %137 = vector.shape_cast %136 : vector<16xf32> to vector<1x16xf32>
    %138 = vector.broadcast %137 : vector<1x16xf32> to vector<8x16xf32>
    %139 = arith.mulf %48, %138 : vector<8x16xf32>
    %140 = arith.addf %128, %139 : vector<8x16xf32>
    %c5 = arith.constant 5 : index
    %c0_55 = arith.constant 0 : index
    %141 = vector.load %arg4[%c5, %c0_55] : memref<64x16xf32, #tpu.memory_space<vmem>>, vector<1x16xf32>
    %142 = vector.shape_cast %141 : vector<1x16xf32> to vector<16xf32>
    %143 = vector.shape_cast %142 : vector<16xf32> to vector<1x16xf32>
    %144 = vector.broadcast %143 : vector<1x16xf32> to vector<8x16xf32>
    %145 = arith.mulf %55, %144 : vector<8x16xf32>
    %146 = arith.addf %134, %145 : vector<8x16xf32>
    %c5_56 = arith.constant 5 : index
    %c0_57 = arith.constant 0 : index
    %147 = vector.load %arg5[%c5_56, %c0_57] : memref<64x16xf32, #tpu.memory_space<vmem>>, vector<1x16xf32>
    %148 = vector.shape_cast %147 : vector<1x16xf32> to vector<16xf32>
    %149 = vector.shape_cast %148 : vector<16xf32> to vector<1x16xf32>
    %150 = vector.broadcast %149 : vector<1x16xf32> to vector<8x16xf32>
    %151 = arith.mulf %55, %150 : vector<8x16xf32>
    %152 = arith.addf %140, %151 : vector<8x16xf32>
    %c6 = arith.constant 6 : index
    %c0_58 = arith.constant 0 : index
    %153 = vector.load %arg4[%c6, %c0_58] : memref<64x16xf32, #tpu.memory_space<vmem>>, vector<1x16xf32>
    %154 = vector.shape_cast %153 : vector<1x16xf32> to vector<16xf32>
    %155 = vector.shape_cast %154 : vector<16xf32> to vector<1x16xf32>
    %156 = vector.broadcast %155 : vector<1x16xf32> to vector<8x16xf32>
    %157 = arith.mulf %62, %156 : vector<8x16xf32>
    %158 = arith.addf %146, %157 : vector<8x16xf32>
    %c6_59 = arith.constant 6 : index
    %c0_60 = arith.constant 0 : index
    %159 = vector.load %arg5[%c6_59, %c0_60] : memref<64x16xf32, #tpu.memory_space<vmem>>, vector<1x16xf32>
    %160 = vector.shape_cast %159 : vector<1x16xf32> to vector<16xf32>
    %161 = vector.shape_cast %160 : vector<16xf32> to vector<1x16xf32>
    %162 = vector.broadcast %161 : vector<1x16xf32> to vector<8x16xf32>
    %163 = arith.mulf %62, %162 : vector<8x16xf32>
    %164 = arith.addf %152, %163 : vector<8x16xf32>
    %c7 = arith.constant 7 : index
    %c0_61 = arith.constant 0 : index
    %165 = vector.load %arg4[%c7, %c0_61] : memref<64x16xf32, #tpu.memory_space<vmem>>, vector<1x16xf32>
    %166 = vector.shape_cast %165 : vector<1x16xf32> to vector<16xf32>
    %167 = vector.shape_cast %166 : vector<16xf32> to vector<1x16xf32>
    %168 = vector.broadcast %167 : vector<1x16xf32> to vector<8x16xf32>
    %169 = arith.mulf %69, %168 : vector<8x16xf32>
    %170 = arith.addf %158, %169 : vector<8x16xf32>
    %c7_62 = arith.constant 7 : index
    %c0_63 = arith.constant 0 : index
    %171 = vector.load %arg5[%c7_62, %c0_63] : memref<64x16xf32, #tpu.memory_space<vmem>>, vector<1x16xf32>
    %172 = vector.shape_cast %171 : vector<1x16xf32> to vector<16xf32>
    %173 = vector.shape_cast %172 : vector<16xf32> to vector<1x16xf32>
    %174 = vector.broadcast %173 : vector<1x16xf32> to vector<8x16xf32>
    %175 = arith.mulf %69, %174 : vector<8x16xf32>
    %176 = arith.addf %164, %175 : vector<8x16xf32>
    %177 = arith.mulf %78, %170 : vector<8x16xf32>
    %178 = arith.addf %70, %177 : vector<8x16xf32>
    %179 = arith.mulf %78, %176 : vector<8x16xf32>
    %180 = arith.addf %71, %179 : vector<8x16xf32>
    %cst_64 = arith.constant 1.000000e+00 : f32
    %181 = vector.broadcast %cst_64 : f32 to vector<8x16xf32>
    %182 = arith.subf %6, %181 : vector<8x16xf32>
    %183 = math.absf %182 : vector<8x16xf32>
    %cst_65 = arith.constant 1.000000e+00 : f32
    %184 = vector.broadcast %cst_65 : f32 to vector<8x16xf32>
    %185 = arith.subf %184, %183 : vector<8x16xf32>
    %cst_66 = arith.constant 0.000000e+00 : f32
    %186 = vector.broadcast %cst_66 : f32 to vector<8x16xf32>
    %187 = arith.maximumf %186, %185 : vector<8x16xf32>
    %cst_67 = arith.constant 0.000000e+00 : f32
    %188 = vector.broadcast %cst_67 : f32 to vector<8x16xf32>
    %cst_68 = arith.constant 0.000000e+00 : f32
    %189 = vector.broadcast %cst_68 : f32 to vector<8x16xf32>
    %c8 = arith.constant 8 : index
    %c0_69 = arith.constant 0 : index
    %190 = vector.load %arg4[%c8, %c0_69] : memref<64x16xf32, #tpu.memory_space<vmem>>, vector<1x16xf32>
    %191 = vector.shape_cast %190 : vector<1x16xf32> to vector<16xf32>
    %192 = vector.shape_cast %191 : vector<16xf32> to vector<1x16xf32>
    %193 = vector.broadcast %192 : vector<1x16xf32> to vector<8x16xf32>
    %194 = arith.mulf %20, %193 : vector<8x16xf32>
    %195 = arith.addf %188, %194 : vector<8x16xf32>
    %c8_70 = arith.constant 8 : index
    %c0_71 = arith.constant 0 : index
    %196 = vector.load %arg5[%c8_70, %c0_71] : memref<64x16xf32, #tpu.memory_space<vmem>>, vector<1x16xf32>
    %197 = vector.shape_cast %196 : vector<1x16xf32> to vector<16xf32>
    %198 = vector.shape_cast %197 : vector<16xf32> to vector<1x16xf32>
    %199 = vector.broadcast %198 : vector<1x16xf32> to vector<8x16xf32>
    %200 = arith.mulf %20, %199 : vector<8x16xf32>
    %201 = arith.addf %189, %200 : vector<8x16xf32>
    %c9 = arith.constant 9 : index
    %c0_72 = arith.constant 0 : index
    %202 = vector.load %arg4[%c9, %c0_72] : memref<64x16xf32, #tpu.memory_space<vmem>>, vector<1x16xf32>
    %203 = vector.shape_cast %202 : vector<1x16xf32> to vector<16xf32>
    %204 = vector.shape_cast %203 : vector<16xf32> to vector<1x16xf32>
    %205 = vector.broadcast %204 : vector<1x16xf32> to vector<8x16xf32>
    %206 = arith.mulf %27, %205 : vector<8x16xf32>
    %207 = arith.addf %195, %206 : vector<8x16xf32>
    %c9_73 = arith.constant 9 : index
    %c0_74 = arith.constant 0 : index
    %208 = vector.load %arg5[%c9_73, %c0_74] : memref<64x16xf32, #tpu.memory_space<vmem>>, vector<1x16xf32>
    %209 = vector.shape_cast %208 : vector<1x16xf32> to vector<16xf32>
    %210 = vector.shape_cast %209 : vector<16xf32> to vector<1x16xf32>
    %211 = vector.broadcast %210 : vector<1x16xf32> to vector<8x16xf32>
    %212 = arith.mulf %27, %211 : vector<8x16xf32>
    %213 = arith.addf %201, %212 : vector<8x16xf32>
    %c10 = arith.constant 10 : index
    %c0_75 = arith.constant 0 : index
    %214 = vector.load %arg4[%c10, %c0_75] : memref<64x16xf32, #tpu.memory_space<vmem>>, vector<1x16xf32>
    %215 = vector.shape_cast %214 : vector<1x16xf32> to vector<16xf32>
    %216 = vector.shape_cast %215 : vector<16xf32> to vector<1x16xf32>
    %217 = vector.broadcast %216 : vector<1x16xf32> to vector<8x16xf32>
    %218 = arith.mulf %34, %217 : vector<8x16xf32>
    %219 = arith.addf %207, %218 : vector<8x16xf32>
    %c10_76 = arith.constant 10 : index
    %c0_77 = arith.constant 0 : index
    %220 = vector.load %arg5[%c10_76, %c0_77] : memref<64x16xf32, #tpu.memory_space<vmem>>, vector<1x16xf32>
    %221 = vector.shape_cast %220 : vector<1x16xf32> to vector<16xf32>
    %222 = vector.shape_cast %221 : vector<16xf32> to vector<1x16xf32>
    %223 = vector.broadcast %222 : vector<1x16xf32> to vector<8x16xf32>
    %224 = arith.mulf %34, %223 : vector<8x16xf32>
    %225 = arith.addf %213, %224 : vector<8x16xf32>
    %c11 = arith.constant 11 : index
    %c0_78 = arith.constant 0 : index
    %226 = vector.load %arg4[%c11, %c0_78] : memref<64x16xf32, #tpu.memory_space<vmem>>, vector<1x16xf32>
    %227 = vector.shape_cast %226 : vector<1x16xf32> to vector<16xf32>
    %228 = vector.shape_cast %227 : vector<16xf32> to vector<1x16xf32>
    %229 = vector.broadcast %228 : vector<1x16xf32> to vector<8x16xf32>
    %230 = arith.mulf %41, %229 : vector<8x16xf32>
    %231 = arith.addf %219, %230 : vector<8x16xf32>
    %c11_79 = arith.constant 11 : index
    %c0_80 = arith.constant 0 : index
    %232 = vector.load %arg5[%c11_79, %c0_80] : memref<64x16xf32, #tpu.memory_space<vmem>>, vector<1x16xf32>
    %233 = vector.shape_cast %232 : vector<1x16xf32> to vector<16xf32>
    %234 = vector.shape_cast %233 : vector<16xf32> to vector<1x16xf32>
    %235 = vector.broadcast %234 : vector<1x16xf32> to vector<8x16xf32>
    %236 = arith.mulf %41, %235 : vector<8x16xf32>
    %237 = arith.addf %225, %236 : vector<8x16xf32>
    %c12 = arith.constant 12 : index
    %c0_81 = arith.constant 0 : index
    %238 = vector.load %arg4[%c12, %c0_81] : memref<64x16xf32, #tpu.memory_space<vmem>>, vector<1x16xf32>
    %239 = vector.shape_cast %238 : vector<1x16xf32> to vector<16xf32>
    %240 = vector.shape_cast %239 : vector<16xf32> to vector<1x16xf32>
    %241 = vector.broadcast %240 : vector<1x16xf32> to vector<8x16xf32>
    %242 = arith.mulf %48, %241 : vector<8x16xf32>
    %243 = arith.addf %231, %242 : vector<8x16xf32>
    %c12_82 = arith.constant 12 : index
    %c0_83 = arith.constant 0 : index
    %244 = vector.load %arg5[%c12_82, %c0_83] : memref<64x16xf32, #tpu.memory_space<vmem>>, vector<1x16xf32>
    %245 = vector.shape_cast %244 : vector<1x16xf32> to vector<16xf32>
    %246 = vector.shape_cast %245 : vector<16xf32> to vector<1x16xf32>
    %247 = vector.broadcast %246 : vector<1x16xf32> to vector<8x16xf32>
    %248 = arith.mulf %48, %247 : vector<8x16xf32>
    %249 = arith.addf %237, %248 : vector<8x16xf32>
    %c13 = arith.constant 13 : index
    %c0_84 = arith.constant 0 : index
    %250 = vector.load %arg4[%c13, %c0_84] : memref<64x16xf32, #tpu.memory_space<vmem>>, vector<1x16xf32>
    %251 = vector.shape_cast %250 : vector<1x16xf32> to vector<16xf32>
    %252 = vector.shape_cast %251 : vector<16xf32> to vector<1x16xf32>
    %253 = vector.broadcast %252 : vector<1x16xf32> to vector<8x16xf32>
    %254 = arith.mulf %55, %253 : vector<8x16xf32>
    %255 = arith.addf %243, %254 : vector<8x16xf32>
    %c13_85 = arith.constant 13 : index
    %c0_86 = arith.constant 0 : index
    %256 = vector.load %arg5[%c13_85, %c0_86] : memref<64x16xf32, #tpu.memory_space<vmem>>, vector<1x16xf32>
    %257 = vector.shape_cast %256 : vector<1x16xf32> to vector<16xf32>
    %258 = vector.shape_cast %257 : vector<16xf32> to vector<1x16xf32>
    %259 = vector.broadcast %258 : vector<1x16xf32> to vector<8x16xf32>
    %260 = arith.mulf %55, %259 : vector<8x16xf32>
    %261 = arith.addf %249, %260 : vector<8x16xf32>
    %c14 = arith.constant 14 : index
    %c0_87 = arith.constant 0 : index
    %262 = vector.load %arg4[%c14, %c0_87] : memref<64x16xf32, #tpu.memory_space<vmem>>, vector<1x16xf32>
    %263 = vector.shape_cast %262 : vector<1x16xf32> to vector<16xf32>
    %264 = vector.shape_cast %263 : vector<16xf32> to vector<1x16xf32>
    %265 = vector.broadcast %264 : vector<1x16xf32> to vector<8x16xf32>
    %266 = arith.mulf %62, %265 : vector<8x16xf32>
    %267 = arith.addf %255, %266 : vector<8x16xf32>
    %c14_88 = arith.constant 14 : index
    %c0_89 = arith.constant 0 : index
    %268 = vector.load %arg5[%c14_88, %c0_89] : memref<64x16xf32, #tpu.memory_space<vmem>>, vector<1x16xf32>
    %269 = vector.shape_cast %268 : vector<1x16xf32> to vector<16xf32>
    %270 = vector.shape_cast %269 : vector<16xf32> to vector<1x16xf32>
    %271 = vector.broadcast %270 : vector<1x16xf32> to vector<8x16xf32>
    %272 = arith.mulf %62, %271 : vector<8x16xf32>
    %273 = arith.addf %261, %272 : vector<8x16xf32>
    %c15 = arith.constant 15 : index
    %c0_90 = arith.constant 0 : index
    %274 = vector.load %arg4[%c15, %c0_90] : memref<64x16xf32, #tpu.memory_space<vmem>>, vector<1x16xf32>
    %275 = vector.shape_cast %274 : vector<1x16xf32> to vector<16xf32>
    %276 = vector.shape_cast %275 : vector<16xf32> to vector<1x16xf32>
    %277 = vector.broadcast %276 : vector<1x16xf32> to vector<8x16xf32>
    %278 = arith.mulf %69, %277 : vector<8x16xf32>
    %279 = arith.addf %267, %278 : vector<8x16xf32>
    %c15_91 = arith.constant 15 : index
    %c0_92 = arith.constant 0 : index
    %280 = vector.load %arg5[%c15_91, %c0_92] : memref<64x16xf32, #tpu.memory_space<vmem>>, vector<1x16xf32>
    %281 = vector.shape_cast %280 : vector<1x16xf32> to vector<16xf32>
    %282 = vector.shape_cast %281 : vector<16xf32> to vector<1x16xf32>
    %283 = vector.broadcast %282 : vector<1x16xf32> to vector<8x16xf32>
    %284 = arith.mulf %69, %283 : vector<8x16xf32>
    %285 = arith.addf %273, %284 : vector<8x16xf32>
    %286 = arith.mulf %187, %279 : vector<8x16xf32>
    %287 = arith.addf %178, %286 : vector<8x16xf32>
    %288 = arith.mulf %187, %285 : vector<8x16xf32>
    %289 = arith.addf %180, %288 : vector<8x16xf32>
    %cst_93 = arith.constant 2.000000e+00 : f32
    %290 = vector.broadcast %cst_93 : f32 to vector<8x16xf32>
    %291 = arith.subf %6, %290 : vector<8x16xf32>
    %292 = math.absf %291 : vector<8x16xf32>
    %cst_94 = arith.constant 1.000000e+00 : f32
    %293 = vector.broadcast %cst_94 : f32 to vector<8x16xf32>
    %294 = arith.subf %293, %292 : vector<8x16xf32>
    %cst_95 = arith.constant 0.000000e+00 : f32
    %295 = vector.broadcast %cst_95 : f32 to vector<8x16xf32>
    %296 = arith.maximumf %295, %294 : vector<8x16xf32>
    %cst_96 = arith.constant 0.000000e+00 : f32
    %297 = vector.broadcast %cst_96 : f32 to vector<8x16xf32>
    %cst_97 = arith.constant 0.000000e+00 : f32
    %298 = vector.broadcast %cst_97 : f32 to vector<8x16xf32>
    %c16 = arith.constant 16 : index
    %c0_98 = arith.constant 0 : index
    %299 = vector.load %arg4[%c16, %c0_98] : memref<64x16xf32, #tpu.memory_space<vmem>>, vector<1x16xf32>
    %300 = vector.shape_cast %299 : vector<1x16xf32> to vector<16xf32>
    %301 = vector.shape_cast %300 : vector<16xf32> to vector<1x16xf32>
    %302 = vector.broadcast %301 : vector<1x16xf32> to vector<8x16xf32>
    %303 = arith.mulf %20, %302 : vector<8x16xf32>
    %304 = arith.addf %297, %303 : vector<8x16xf32>
    %c16_99 = arith.constant 16 : index
    %c0_100 = arith.constant 0 : index
    %305 = vector.load %arg5[%c16_99, %c0_100] : memref<64x16xf32, #tpu.memory_space<vmem>>, vector<1x16xf32>
    %306 = vector.shape_cast %305 : vector<1x16xf32> to vector<16xf32>
    %307 = vector.shape_cast %306 : vector<16xf32> to vector<1x16xf32>
    %308 = vector.broadcast %307 : vector<1x16xf32> to vector<8x16xf32>
    %309 = arith.mulf %20, %308 : vector<8x16xf32>
    %310 = arith.addf %298, %309 : vector<8x16xf32>
    %c17 = arith.constant 17 : index
    %c0_101 = arith.constant 0 : index
    %311 = vector.load %arg4[%c17, %c0_101] : memref<64x16xf32, #tpu.memory_space<vmem>>, vector<1x16xf32>
    %312 = vector.shape_cast %311 : vector<1x16xf32> to vector<16xf32>
    %313 = vector.shape_cast %312 : vector<16xf32> to vector<1x16xf32>
    %314 = vector.broadcast %313 : vector<1x16xf32> to vector<8x16xf32>
    %315 = arith.mulf %27, %314 : vector<8x16xf32>
    %316 = arith.addf %304, %315 : vector<8x16xf32>
    %c17_102 = arith.constant 17 : index
    %c0_103 = arith.constant 0 : index
    %317 = vector.load %arg5[%c17_102, %c0_103] : memref<64x16xf32, #tpu.memory_space<vmem>>, vector<1x16xf32>
    %318 = vector.shape_cast %317 : vector<1x16xf32> to vector<16xf32>
    %319 = vector.shape_cast %318 : vector<16xf32> to vector<1x16xf32>
    %320 = vector.broadcast %319 : vector<1x16xf32> to vector<8x16xf32>
    %321 = arith.mulf %27, %320 : vector<8x16xf32>
    %322 = arith.addf %310, %321 : vector<8x16xf32>
    %c18 = arith.constant 18 : index
    %c0_104 = arith.constant 0 : index
    %323 = vector.load %arg4[%c18, %c0_104] : memref<64x16xf32, #tpu.memory_space<vmem>>, vector<1x16xf32>
    %324 = vector.shape_cast %323 : vector<1x16xf32> to vector<16xf32>
    %325 = vector.shape_cast %324 : vector<16xf32> to vector<1x16xf32>
    %326 = vector.broadcast %325 : vector<1x16xf32> to vector<8x16xf32>
    %327 = arith.mulf %34, %326 : vector<8x16xf32>
    %328 = arith.addf %316, %327 : vector<8x16xf32>
    %c18_105 = arith.constant 18 : index
    %c0_106 = arith.constant 0 : index
    %329 = vector.load %arg5[%c18_105, %c0_106] : memref<64x16xf32, #tpu.memory_space<vmem>>, vector<1x16xf32>
    %330 = vector.shape_cast %329 : vector<1x16xf32> to vector<16xf32>
    %331 = vector.shape_cast %330 : vector<16xf32> to vector<1x16xf32>
    %332 = vector.broadcast %331 : vector<1x16xf32> to vector<8x16xf32>
    %333 = arith.mulf %34, %332 : vector<8x16xf32>
    %334 = arith.addf %322, %333 : vector<8x16xf32>
    %c19 = arith.constant 19 : index
    %c0_107 = arith.constant 0 : index
    %335 = vector.load %arg4[%c19, %c0_107] : memref<64x16xf32, #tpu.memory_space<vmem>>, vector<1x16xf32>
    %336 = vector.shape_cast %335 : vector<1x16xf32> to vector<16xf32>
    %337 = vector.shape_cast %336 : vector<16xf32> to vector<1x16xf32>
    %338 = vector.broadcast %337 : vector<1x16xf32> to vector<8x16xf32>
    %339 = arith.mulf %41, %338 : vector<8x16xf32>
    %340 = arith.addf %328, %339 : vector<8x16xf32>
    %c19_108 = arith.constant 19 : index
    %c0_109 = arith.constant 0 : index
    %341 = vector.load %arg5[%c19_108, %c0_109] : memref<64x16xf32, #tpu.memory_space<vmem>>, vector<1x16xf32>
    %342 = vector.shape_cast %341 : vector<1x16xf32> to vector<16xf32>
    %343 = vector.shape_cast %342 : vector<16xf32> to vector<1x16xf32>
    %344 = vector.broadcast %343 : vector<1x16xf32> to vector<8x16xf32>
    %345 = arith.mulf %41, %344 : vector<8x16xf32>
    %346 = arith.addf %334, %345 : vector<8x16xf32>
    %c20 = arith.constant 20 : index
    %c0_110 = arith.constant 0 : index
    %347 = vector.load %arg4[%c20, %c0_110] : memref<64x16xf32, #tpu.memory_space<vmem>>, vector<1x16xf32>
    %348 = vector.shape_cast %347 : vector<1x16xf32> to vector<16xf32>
    %349 = vector.shape_cast %348 : vector<16xf32> to vector<1x16xf32>
    %350 = vector.broadcast %349 : vector<1x16xf32> to vector<8x16xf32>
    %351 = arith.mulf %48, %350 : vector<8x16xf32>
    %352 = arith.addf %340, %351 : vector<8x16xf32>
    %c20_111 = arith.constant 20 : index
    %c0_112 = arith.constant 0 : index
    %353 = vector.load %arg5[%c20_111, %c0_112] : memref<64x16xf32, #tpu.memory_space<vmem>>, vector<1x16xf32>
    %354 = vector.shape_cast %353 : vector<1x16xf32> to vector<16xf32>
    %355 = vector.shape_cast %354 : vector<16xf32> to vector<1x16xf32>
    %356 = vector.broadcast %355 : vector<1x16xf32> to vector<8x16xf32>
    %357 = arith.mulf %48, %356 : vector<8x16xf32>
    %358 = arith.addf %346, %357 : vector<8x16xf32>
    %c21 = arith.constant 21 : index
    %c0_113 = arith.constant 0 : index
    %359 = vector.load %arg4[%c21, %c0_113] : memref<64x16xf32, #tpu.memory_space<vmem>>, vector<1x16xf32>
    %360 = vector.shape_cast %359 : vector<1x16xf32> to vector<16xf32>
    %361 = vector.shape_cast %360 : vector<16xf32> to vector<1x16xf32>
    %362 = vector.broadcast %361 : vector<1x16xf32> to vector<8x16xf32>
    %363 = arith.mulf %55, %362 : vector<8x16xf32>
    %364 = arith.addf %352, %363 : vector<8x16xf32>
    %c21_114 = arith.constant 21 : index
    %c0_115 = arith.constant 0 : index
    %365 = vector.load %arg5[%c21_114, %c0_115] : memref<64x16xf32, #tpu.memory_space<vmem>>, vector<1x16xf32>
    %366 = vector.shape_cast %365 : vector<1x16xf32> to vector<16xf32>
    %367 = vector.shape_cast %366 : vector<16xf32> to vector<1x16xf32>
    %368 = vector.broadcast %367 : vector<1x16xf32> to vector<8x16xf32>
    %369 = arith.mulf %55, %368 : vector<8x16xf32>
    %370 = arith.addf %358, %369 : vector<8x16xf32>
    %c22 = arith.constant 22 : index
    %c0_116 = arith.constant 0 : index
    %371 = vector.load %arg4[%c22, %c0_116] : memref<64x16xf32, #tpu.memory_space<vmem>>, vector<1x16xf32>
    %372 = vector.shape_cast %371 : vector<1x16xf32> to vector<16xf32>
    %373 = vector.shape_cast %372 : vector<16xf32> to vector<1x16xf32>
    %374 = vector.broadcast %373 : vector<1x16xf32> to vector<8x16xf32>
    %375 = arith.mulf %62, %374 : vector<8x16xf32>
    %376 = arith.addf %364, %375 : vector<8x16xf32>
    %c22_117 = arith.constant 22 : index
    %c0_118 = arith.constant 0 : index
    %377 = vector.load %arg5[%c22_117, %c0_118] : memref<64x16xf32, #tpu.memory_space<vmem>>, vector<1x16xf32>
    %378 = vector.shape_cast %377 : vector<1x16xf32> to vector<16xf32>
    %379 = vector.shape_cast %378 : vector<16xf32> to vector<1x16xf32>
    %380 = vector.broadcast %379 : vector<1x16xf32> to vector<8x16xf32>
    %381 = arith.mulf %62, %380 : vector<8x16xf32>
    %382 = arith.addf %370, %381 : vector<8x16xf32>
    %c23 = arith.constant 23 : index
    %c0_119 = arith.constant 0 : index
    %383 = vector.load %arg4[%c23, %c0_119] : memref<64x16xf32, #tpu.memory_space<vmem>>, vector<1x16xf32>
    %384 = vector.shape_cast %383 : vector<1x16xf32> to vector<16xf32>
    %385 = vector.shape_cast %384 : vector<16xf32> to vector<1x16xf32>
    %386 = vector.broadcast %385 : vector<1x16xf32> to vector<8x16xf32>
    %387 = arith.mulf %69, %386 : vector<8x16xf32>
    %388 = arith.addf %376, %387 : vector<8x16xf32>
    %c23_120 = arith.constant 23 : index
    %c0_121 = arith.constant 0 : index
    %389 = vector.load %arg5[%c23_120, %c0_121] : memref<64x16xf32, #tpu.memory_space<vmem>>, vector<1x16xf32>
    %390 = vector.shape_cast %389 : vector<1x16xf32> to vector<16xf32>
    %391 = vector.shape_cast %390 : vector<16xf32> to vector<1x16xf32>
    %392 = vector.broadcast %391 : vector<1x16xf32> to vector<8x16xf32>
    %393 = arith.mulf %69, %392 : vector<8x16xf32>
    %394 = arith.addf %382, %393 : vector<8x16xf32>
    %395 = arith.mulf %296, %388 : vector<8x16xf32>
    %396 = arith.addf %287, %395 : vector<8x16xf32>
    %397 = arith.mulf %296, %394 : vector<8x16xf32>
    %398 = arith.addf %289, %397 : vector<8x16xf32>
    %cst_122 = arith.constant 3.000000e+00 : f32
    %399 = vector.broadcast %cst_122 : f32 to vector<8x16xf32>
    %400 = arith.subf %6, %399 : vector<8x16xf32>
    %401 = math.absf %400 : vector<8x16xf32>
    %cst_123 = arith.constant 1.000000e+00 : f32
    %402 = vector.broadcast %cst_123 : f32 to vector<8x16xf32>
    %403 = arith.subf %402, %401 : vector<8x16xf32>
    %cst_124 = arith.constant 0.000000e+00 : f32
    %404 = vector.broadcast %cst_124 : f32 to vector<8x16xf32>
    %405 = arith.maximumf %404, %403 : vector<8x16xf32>
    %cst_125 = arith.constant 0.000000e+00 : f32
    %406 = vector.broadcast %cst_125 : f32 to vector<8x16xf32>
    %cst_126 = arith.constant 0.000000e+00 : f32
    %407 = vector.broadcast %cst_126 : f32 to vector<8x16xf32>
    %c24 = arith.constant 24 : index
    %c0_127 = arith.constant 0 : index
    %408 = vector.load %arg4[%c24, %c0_127] : memref<64x16xf32, #tpu.memory_space<vmem>>, vector<1x16xf32>
    %409 = vector.shape_cast %408 : vector<1x16xf32> to vector<16xf32>
    %410 = vector.shape_cast %409 : vector<16xf32> to vector<1x16xf32>
    %411 = vector.broadcast %410 : vector<1x16xf32> to vector<8x16xf32>
    %412 = arith.mulf %20, %411 : vector<8x16xf32>
    %413 = arith.addf %406, %412 : vector<8x16xf32>
    %c24_128 = arith.constant 24 : index
    %c0_129 = arith.constant 0 : index
    %414 = vector.load %arg5[%c24_128, %c0_129] : memref<64x16xf32, #tpu.memory_space<vmem>>, vector<1x16xf32>
    %415 = vector.shape_cast %414 : vector<1x16xf32> to vector<16xf32>
    %416 = vector.shape_cast %415 : vector<16xf32> to vector<1x16xf32>
    %417 = vector.broadcast %416 : vector<1x16xf32> to vector<8x16xf32>
    %418 = arith.mulf %20, %417 : vector<8x16xf32>
    %419 = arith.addf %407, %418 : vector<8x16xf32>
    %c25 = arith.constant 25 : index
    %c0_130 = arith.constant 0 : index
    %420 = vector.load %arg4[%c25, %c0_130] : memref<64x16xf32, #tpu.memory_space<vmem>>, vector<1x16xf32>
    %421 = vector.shape_cast %420 : vector<1x16xf32> to vector<16xf32>
    %422 = vector.shape_cast %421 : vector<16xf32> to vector<1x16xf32>
    %423 = vector.broadcast %422 : vector<1x16xf32> to vector<8x16xf32>
    %424 = arith.mulf %27, %423 : vector<8x16xf32>
    %425 = arith.addf %413, %424 : vector<8x16xf32>
    %c25_131 = arith.constant 25 : index
    %c0_132 = arith.constant 0 : index
    %426 = vector.load %arg5[%c25_131, %c0_132] : memref<64x16xf32, #tpu.memory_space<vmem>>, vector<1x16xf32>
    %427 = vector.shape_cast %426 : vector<1x16xf32> to vector<16xf32>
    %428 = vector.shape_cast %427 : vector<16xf32> to vector<1x16xf32>
    %429 = vector.broadcast %428 : vector<1x16xf32> to vector<8x16xf32>
    %430 = arith.mulf %27, %429 : vector<8x16xf32>
    %431 = arith.addf %419, %430 : vector<8x16xf32>
    %c26 = arith.constant 26 : index
    %c0_133 = arith.constant 0 : index
    %432 = vector.load %arg4[%c26, %c0_133] : memref<64x16xf32, #tpu.memory_space<vmem>>, vector<1x16xf32>
    %433 = vector.shape_cast %432 : vector<1x16xf32> to vector<16xf32>
    %434 = vector.shape_cast %433 : vector<16xf32> to vector<1x16xf32>
    %435 = vector.broadcast %434 : vector<1x16xf32> to vector<8x16xf32>
    %436 = arith.mulf %34, %435 : vector<8x16xf32>
    %437 = arith.addf %425, %436 : vector<8x16xf32>
    %c26_134 = arith.constant 26 : index
    %c0_135 = arith.constant 0 : index
    %438 = vector.load %arg5[%c26_134, %c0_135] : memref<64x16xf32, #tpu.memory_space<vmem>>, vector<1x16xf32>
    %439 = vector.shape_cast %438 : vector<1x16xf32> to vector<16xf32>
    %440 = vector.shape_cast %439 : vector<16xf32> to vector<1x16xf32>
    %441 = vector.broadcast %440 : vector<1x16xf32> to vector<8x16xf32>
    %442 = arith.mulf %34, %441 : vector<8x16xf32>
    %443 = arith.addf %431, %442 : vector<8x16xf32>
    %c27 = arith.constant 27 : index
    %c0_136 = arith.constant 0 : index
    %444 = vector.load %arg4[%c27, %c0_136] : memref<64x16xf32, #tpu.memory_space<vmem>>, vector<1x16xf32>
    %445 = vector.shape_cast %444 : vector<1x16xf32> to vector<16xf32>
    %446 = vector.shape_cast %445 : vector<16xf32> to vector<1x16xf32>
    %447 = vector.broadcast %446 : vector<1x16xf32> to vector<8x16xf32>
    %448 = arith.mulf %41, %447 : vector<8x16xf32>
    %449 = arith.addf %437, %448 : vector<8x16xf32>
    %c27_137 = arith.constant 27 : index
    %c0_138 = arith.constant 0 : index
    %450 = vector.load %arg5[%c27_137, %c0_138] : memref<64x16xf32, #tpu.memory_space<vmem>>, vector<1x16xf32>
    %451 = vector.shape_cast %450 : vector<1x16xf32> to vector<16xf32>
    %452 = vector.shape_cast %451 : vector<16xf32> to vector<1x16xf32>
    %453 = vector.broadcast %452 : vector<1x16xf32> to vector<8x16xf32>
    %454 = arith.mulf %41, %453 : vector<8x16xf32>
    %455 = arith.addf %443, %454 : vector<8x16xf32>
    %c28 = arith.constant 28 : index
    %c0_139 = arith.constant 0 : index
    %456 = vector.load %arg4[%c28, %c0_139] : memref<64x16xf32, #tpu.memory_space<vmem>>, vector<1x16xf32>
    %457 = vector.shape_cast %456 : vector<1x16xf32> to vector<16xf32>
    %458 = vector.shape_cast %457 : vector<16xf32> to vector<1x16xf32>
    %459 = vector.broadcast %458 : vector<1x16xf32> to vector<8x16xf32>
    %460 = arith.mulf %48, %459 : vector<8x16xf32>
    %461 = arith.addf %449, %460 : vector<8x16xf32>
    %c28_140 = arith.constant 28 : index
    %c0_141 = arith.constant 0 : index
    %462 = vector.load %arg5[%c28_140, %c0_141] : memref<64x16xf32, #tpu.memory_space<vmem>>, vector<1x16xf32>
    %463 = vector.shape_cast %462 : vector<1x16xf32> to vector<16xf32>
    %464 = vector.shape_cast %463 : vector<16xf32> to vector<1x16xf32>
    %465 = vector.broadcast %464 : vector<1x16xf32> to vector<8x16xf32>
    %466 = arith.mulf %48, %465 : vector<8x16xf32>
    %467 = arith.addf %455, %466 : vector<8x16xf32>
    %c29 = arith.constant 29 : index
    %c0_142 = arith.constant 0 : index
    %468 = vector.load %arg4[%c29, %c0_142] : memref<64x16xf32, #tpu.memory_space<vmem>>, vector<1x16xf32>
    %469 = vector.shape_cast %468 : vector<1x16xf32> to vector<16xf32>
    %470 = vector.shape_cast %469 : vector<16xf32> to vector<1x16xf32>
    %471 = vector.broadcast %470 : vector<1x16xf32> to vector<8x16xf32>
    %472 = arith.mulf %55, %471 : vector<8x16xf32>
    %473 = arith.addf %461, %472 : vector<8x16xf32>
    %c29_143 = arith.constant 29 : index
    %c0_144 = arith.constant 0 : index
    %474 = vector.load %arg5[%c29_143, %c0_144] : memref<64x16xf32, #tpu.memory_space<vmem>>, vector<1x16xf32>
    %475 = vector.shape_cast %474 : vector<1x16xf32> to vector<16xf32>
    %476 = vector.shape_cast %475 : vector<16xf32> to vector<1x16xf32>
    %477 = vector.broadcast %476 : vector<1x16xf32> to vector<8x16xf32>
    %478 = arith.mulf %55, %477 : vector<8x16xf32>
    %479 = arith.addf %467, %478 : vector<8x16xf32>
    %c30 = arith.constant 30 : index
    %c0_145 = arith.constant 0 : index
    %480 = vector.load %arg4[%c30, %c0_145] : memref<64x16xf32, #tpu.memory_space<vmem>>, vector<1x16xf32>
    %481 = vector.shape_cast %480 : vector<1x16xf32> to vector<16xf32>
    %482 = vector.shape_cast %481 : vector<16xf32> to vector<1x16xf32>
    %483 = vector.broadcast %482 : vector<1x16xf32> to vector<8x16xf32>
    %484 = arith.mulf %62, %483 : vector<8x16xf32>
    %485 = arith.addf %473, %484 : vector<8x16xf32>
    %c30_146 = arith.constant 30 : index
    %c0_147 = arith.constant 0 : index
    %486 = vector.load %arg5[%c30_146, %c0_147] : memref<64x16xf32, #tpu.memory_space<vmem>>, vector<1x16xf32>
    %487 = vector.shape_cast %486 : vector<1x16xf32> to vector<16xf32>
    %488 = vector.shape_cast %487 : vector<16xf32> to vector<1x16xf32>
    %489 = vector.broadcast %488 : vector<1x16xf32> to vector<8x16xf32>
    %490 = arith.mulf %62, %489 : vector<8x16xf32>
    %491 = arith.addf %479, %490 : vector<8x16xf32>
    %c31 = arith.constant 31 : index
    %c0_148 = arith.constant 0 : index
    %492 = vector.load %arg4[%c31, %c0_148] : memref<64x16xf32, #tpu.memory_space<vmem>>, vector<1x16xf32>
    %493 = vector.shape_cast %492 : vector<1x16xf32> to vector<16xf32>
    %494 = vector.shape_cast %493 : vector<16xf32> to vector<1x16xf32>
    %495 = vector.broadcast %494 : vector<1x16xf32> to vector<8x16xf32>
    %496 = arith.mulf %69, %495 : vector<8x16xf32>
    %497 = arith.addf %485, %496 : vector<8x16xf32>
    %c31_149 = arith.constant 31 : index
    %c0_150 = arith.constant 0 : index
    %498 = vector.load %arg5[%c31_149, %c0_150] : memref<64x16xf32, #tpu.memory_space<vmem>>, vector<1x16xf32>
    %499 = vector.shape_cast %498 : vector<1x16xf32> to vector<16xf32>
    %500 = vector.shape_cast %499 : vector<16xf32> to vector<1x16xf32>
    %501 = vector.broadcast %500 : vector<1x16xf32> to vector<8x16xf32>
    %502 = arith.mulf %69, %501 : vector<8x16xf32>
    %503 = arith.addf %491, %502 : vector<8x16xf32>
    %504 = arith.mulf %405, %497 : vector<8x16xf32>
    %505 = arith.addf %396, %504 : vector<8x16xf32>
    %506 = arith.mulf %405, %503 : vector<8x16xf32>
    %507 = arith.addf %398, %506 : vector<8x16xf32>
    %cst_151 = arith.constant 4.000000e+00 : f32
    %508 = vector.broadcast %cst_151 : f32 to vector<8x16xf32>
    %509 = arith.subf %6, %508 : vector<8x16xf32>
    %510 = math.absf %509 : vector<8x16xf32>
    %cst_152 = arith.constant 1.000000e+00 : f32
    %511 = vector.broadcast %cst_152 : f32 to vector<8x16xf32>
    %512 = arith.subf %511, %510 : vector<8x16xf32>
    %cst_153 = arith.constant 0.000000e+00 : f32
    %513 = vector.broadcast %cst_153 : f32 to vector<8x16xf32>
    %514 = arith.maximumf %513, %512 : vector<8x16xf32>
    %cst_154 = arith.constant 0.000000e+00 : f32
    %515 = vector.broadcast %cst_154 : f32 to vector<8x16xf32>
    %cst_155 = arith.constant 0.000000e+00 : f32
    %516 = vector.broadcast %cst_155 : f32 to vector<8x16xf32>
    %c32 = arith.constant 32 : index
    %c0_156 = arith.constant 0 : index
    %517 = vector.load %arg4[%c32, %c0_156] : memref<64x16xf32, #tpu.memory_space<vmem>>, vector<1x16xf32>
    %518 = vector.shape_cast %517 : vector<1x16xf32> to vector<16xf32>
    %519 = vector.shape_cast %518 : vector<16xf32> to vector<1x16xf32>
    %520 = vector.broadcast %519 : vector<1x16xf32> to vector<8x16xf32>
    %521 = arith.mulf %20, %520 : vector<8x16xf32>
    %522 = arith.addf %515, %521 : vector<8x16xf32>
    %c32_157 = arith.constant 32 : index
    %c0_158 = arith.constant 0 : index
    %523 = vector.load %arg5[%c32_157, %c0_158] : memref<64x16xf32, #tpu.memory_space<vmem>>, vector<1x16xf32>
    %524 = vector.shape_cast %523 : vector<1x16xf32> to vector<16xf32>
    %525 = vector.shape_cast %524 : vector<16xf32> to vector<1x16xf32>
    %526 = vector.broadcast %525 : vector<1x16xf32> to vector<8x16xf32>
    %527 = arith.mulf %20, %526 : vector<8x16xf32>
    %528 = arith.addf %516, %527 : vector<8x16xf32>
    %c33 = arith.constant 33 : index
    %c0_159 = arith.constant 0 : index
    %529 = vector.load %arg4[%c33, %c0_159] : memref<64x16xf32, #tpu.memory_space<vmem>>, vector<1x16xf32>
    %530 = vector.shape_cast %529 : vector<1x16xf32> to vector<16xf32>
    %531 = vector.shape_cast %530 : vector<16xf32> to vector<1x16xf32>
    %532 = vector.broadcast %531 : vector<1x16xf32> to vector<8x16xf32>
    %533 = arith.mulf %27, %532 : vector<8x16xf32>
    %534 = arith.addf %522, %533 : vector<8x16xf32>
    %c33_160 = arith.constant 33 : index
    %c0_161 = arith.constant 0 : index
    %535 = vector.load %arg5[%c33_160, %c0_161] : memref<64x16xf32, #tpu.memory_space<vmem>>, vector<1x16xf32>
    %536 = vector.shape_cast %535 : vector<1x16xf32> to vector<16xf32>
    %537 = vector.shape_cast %536 : vector<16xf32> to vector<1x16xf32>
    %538 = vector.broadcast %537 : vector<1x16xf32> to vector<8x16xf32>
    %539 = arith.mulf %27, %538 : vector<8x16xf32>
    %540 = arith.addf %528, %539 : vector<8x16xf32>
    %c34 = arith.constant 34 : index
    %c0_162 = arith.constant 0 : index
    %541 = vector.load %arg4[%c34, %c0_162] : memref<64x16xf32, #tpu.memory_space<vmem>>, vector<1x16xf32>
    %542 = vector.shape_cast %541 : vector<1x16xf32> to vector<16xf32>
    %543 = vector.shape_cast %542 : vector<16xf32> to vector<1x16xf32>
    %544 = vector.broadcast %543 : vector<1x16xf32> to vector<8x16xf32>
    %545 = arith.mulf %34, %544 : vector<8x16xf32>
    %546 = arith.addf %534, %545 : vector<8x16xf32>
    %c34_163 = arith.constant 34 : index
    %c0_164 = arith.constant 0 : index
    %547 = vector.load %arg5[%c34_163, %c0_164] : memref<64x16xf32, #tpu.memory_space<vmem>>, vector<1x16xf32>
    %548 = vector.shape_cast %547 : vector<1x16xf32> to vector<16xf32>
    %549 = vector.shape_cast %548 : vector<16xf32> to vector<1x16xf32>
    %550 = vector.broadcast %549 : vector<1x16xf32> to vector<8x16xf32>
    %551 = arith.mulf %34, %550 : vector<8x16xf32>
    %552 = arith.addf %540, %551 : vector<8x16xf32>
    %c35 = arith.constant 35 : index
    %c0_165 = arith.constant 0 : index
    %553 = vector.load %arg4[%c35, %c0_165] : memref<64x16xf32, #tpu.memory_space<vmem>>, vector<1x16xf32>
    %554 = vector.shape_cast %553 : vector<1x16xf32> to vector<16xf32>
    %555 = vector.shape_cast %554 : vector<16xf32> to vector<1x16xf32>
    %556 = vector.broadcast %555 : vector<1x16xf32> to vector<8x16xf32>
    %557 = arith.mulf %41, %556 : vector<8x16xf32>
    %558 = arith.addf %546, %557 : vector<8x16xf32>
    %c35_166 = arith.constant 35 : index
    %c0_167 = arith.constant 0 : index
    %559 = vector.load %arg5[%c35_166, %c0_167] : memref<64x16xf32, #tpu.memory_space<vmem>>, vector<1x16xf32>
    %560 = vector.shape_cast %559 : vector<1x16xf32> to vector<16xf32>
    %561 = vector.shape_cast %560 : vector<16xf32> to vector<1x16xf32>
    %562 = vector.broadcast %561 : vector<1x16xf32> to vector<8x16xf32>
    %563 = arith.mulf %41, %562 : vector<8x16xf32>
    %564 = arith.addf %552, %563 : vector<8x16xf32>
    %c36 = arith.constant 36 : index
    %c0_168 = arith.constant 0 : index
    %565 = vector.load %arg4[%c36, %c0_168] : memref<64x16xf32, #tpu.memory_space<vmem>>, vector<1x16xf32>
    %566 = vector.shape_cast %565 : vector<1x16xf32> to vector<16xf32>
    %567 = vector.shape_cast %566 : vector<16xf32> to vector<1x16xf32>
    %568 = vector.broadcast %567 : vector<1x16xf32> to vector<8x16xf32>
    %569 = arith.mulf %48, %568 : vector<8x16xf32>
    %570 = arith.addf %558, %569 : vector<8x16xf32>
    %c36_169 = arith.constant 36 : index
    %c0_170 = arith.constant 0 : index
    %571 = vector.load %arg5[%c36_169, %c0_170] : memref<64x16xf32, #tpu.memory_space<vmem>>, vector<1x16xf32>
    %572 = vector.shape_cast %571 : vector<1x16xf32> to vector<16xf32>
    %573 = vector.shape_cast %572 : vector<16xf32> to vector<1x16xf32>
    %574 = vector.broadcast %573 : vector<1x16xf32> to vector<8x16xf32>
    %575 = arith.mulf %48, %574 : vector<8x16xf32>
    %576 = arith.addf %564, %575 : vector<8x16xf32>
    %c37 = arith.constant 37 : index
    %c0_171 = arith.constant 0 : index
    %577 = vector.load %arg4[%c37, %c0_171] : memref<64x16xf32, #tpu.memory_space<vmem>>, vector<1x16xf32>
    %578 = vector.shape_cast %577 : vector<1x16xf32> to vector<16xf32>
    %579 = vector.shape_cast %578 : vector<16xf32> to vector<1x16xf32>
    %580 = vector.broadcast %579 : vector<1x16xf32> to vector<8x16xf32>
    %581 = arith.mulf %55, %580 : vector<8x16xf32>
    %582 = arith.addf %570, %581 : vector<8x16xf32>
    %c37_172 = arith.constant 37 : index
    %c0_173 = arith.constant 0 : index
    %583 = vector.load %arg5[%c37_172, %c0_173] : memref<64x16xf32, #tpu.memory_space<vmem>>, vector<1x16xf32>
    %584 = vector.shape_cast %583 : vector<1x16xf32> to vector<16xf32>
    %585 = vector.shape_cast %584 : vector<16xf32> to vector<1x16xf32>
    %586 = vector.broadcast %585 : vector<1x16xf32> to vector<8x16xf32>
    %587 = arith.mulf %55, %586 : vector<8x16xf32>
    %588 = arith.addf %576, %587 : vector<8x16xf32>
    %c38 = arith.constant 38 : index
    %c0_174 = arith.constant 0 : index
    %589 = vector.load %arg4[%c38, %c0_174] : memref<64x16xf32, #tpu.memory_space<vmem>>, vector<1x16xf32>
    %590 = vector.shape_cast %589 : vector<1x16xf32> to vector<16xf32>
    %591 = vector.shape_cast %590 : vector<16xf32> to vector<1x16xf32>
    %592 = vector.broadcast %591 : vector<1x16xf32> to vector<8x16xf32>
    %593 = arith.mulf %62, %592 : vector<8x16xf32>
    %594 = arith.addf %582, %593 : vector<8x16xf32>
    %c38_175 = arith.constant 38 : index
    %c0_176 = arith.constant 0 : index
    %595 = vector.load %arg5[%c38_175, %c0_176] : memref<64x16xf32, #tpu.memory_space<vmem>>, vector<1x16xf32>
    %596 = vector.shape_cast %595 : vector<1x16xf32> to vector<16xf32>
    %597 = vector.shape_cast %596 : vector<16xf32> to vector<1x16xf32>
    %598 = vector.broadcast %597 : vector<1x16xf32> to vector<8x16xf32>
    %599 = arith.mulf %62, %598 : vector<8x16xf32>
    %600 = arith.addf %588, %599 : vector<8x16xf32>
    %c39 = arith.constant 39 : index
    %c0_177 = arith.constant 0 : index
    %601 = vector.load %arg4[%c39, %c0_177] : memref<64x16xf32, #tpu.memory_space<vmem>>, vector<1x16xf32>
    %602 = vector.shape_cast %601 : vector<1x16xf32> to vector<16xf32>
    %603 = vector.shape_cast %602 : vector<16xf32> to vector<1x16xf32>
    %604 = vector.broadcast %603 : vector<1x16xf32> to vector<8x16xf32>
    %605 = arith.mulf %69, %604 : vector<8x16xf32>
    %606 = arith.addf %594, %605 : vector<8x16xf32>
    %c39_178 = arith.constant 39 : index
    %c0_179 = arith.constant 0 : index
    %607 = vector.load %arg5[%c39_178, %c0_179] : memref<64x16xf32, #tpu.memory_space<vmem>>, vector<1x16xf32>
    %608 = vector.shape_cast %607 : vector<1x16xf32> to vector<16xf32>
    %609 = vector.shape_cast %608 : vector<16xf32> to vector<1x16xf32>
    %610 = vector.broadcast %609 : vector<1x16xf32> to vector<8x16xf32>
    %611 = arith.mulf %69, %610 : vector<8x16xf32>
    %612 = arith.addf %600, %611 : vector<8x16xf32>
    %613 = arith.mulf %514, %606 : vector<8x16xf32>
    %614 = arith.addf %505, %613 : vector<8x16xf32>
    %615 = arith.mulf %514, %612 : vector<8x16xf32>
    %616 = arith.addf %507, %615 : vector<8x16xf32>
    %cst_180 = arith.constant 5.000000e+00 : f32
    %617 = vector.broadcast %cst_180 : f32 to vector<8x16xf32>
    %618 = arith.subf %6, %617 : vector<8x16xf32>
    %619 = math.absf %618 : vector<8x16xf32>
    %cst_181 = arith.constant 1.000000e+00 : f32
    %620 = vector.broadcast %cst_181 : f32 to vector<8x16xf32>
    %621 = arith.subf %620, %619 : vector<8x16xf32>
    %cst_182 = arith.constant 0.000000e+00 : f32
    %622 = vector.broadcast %cst_182 : f32 to vector<8x16xf32>
    %623 = arith.maximumf %622, %621 : vector<8x16xf32>
    %cst_183 = arith.constant 0.000000e+00 : f32
    %624 = vector.broadcast %cst_183 : f32 to vector<8x16xf32>
    %cst_184 = arith.constant 0.000000e+00 : f32
    %625 = vector.broadcast %cst_184 : f32 to vector<8x16xf32>
    %c40 = arith.constant 40 : index
    %c0_185 = arith.constant 0 : index
    %626 = vector.load %arg4[%c40, %c0_185] : memref<64x16xf32, #tpu.memory_space<vmem>>, vector<1x16xf32>
    %627 = vector.shape_cast %626 : vector<1x16xf32> to vector<16xf32>
    %628 = vector.shape_cast %627 : vector<16xf32> to vector<1x16xf32>
    %629 = vector.broadcast %628 : vector<1x16xf32> to vector<8x16xf32>
    %630 = arith.mulf %20, %629 : vector<8x16xf32>
    %631 = arith.addf %624, %630 : vector<8x16xf32>
    %c40_186 = arith.constant 40 : index
    %c0_187 = arith.constant 0 : index
    %632 = vector.load %arg5[%c40_186, %c0_187] : memref<64x16xf32, #tpu.memory_space<vmem>>, vector<1x16xf32>
    %633 = vector.shape_cast %632 : vector<1x16xf32> to vector<16xf32>
    %634 = vector.shape_cast %633 : vector<16xf32> to vector<1x16xf32>
    %635 = vector.broadcast %634 : vector<1x16xf32> to vector<8x16xf32>
    %636 = arith.mulf %20, %635 : vector<8x16xf32>
    %637 = arith.addf %625, %636 : vector<8x16xf32>
    %c41 = arith.constant 41 : index
    %c0_188 = arith.constant 0 : index
    %638 = vector.load %arg4[%c41, %c0_188] : memref<64x16xf32, #tpu.memory_space<vmem>>, vector<1x16xf32>
    %639 = vector.shape_cast %638 : vector<1x16xf32> to vector<16xf32>
    %640 = vector.shape_cast %639 : vector<16xf32> to vector<1x16xf32>
    %641 = vector.broadcast %640 : vector<1x16xf32> to vector<8x16xf32>
    %642 = arith.mulf %27, %641 : vector<8x16xf32>
    %643 = arith.addf %631, %642 : vector<8x16xf32>
    %c41_189 = arith.constant 41 : index
    %c0_190 = arith.constant 0 : index
    %644 = vector.load %arg5[%c41_189, %c0_190] : memref<64x16xf32, #tpu.memory_space<vmem>>, vector<1x16xf32>
    %645 = vector.shape_cast %644 : vector<1x16xf32> to vector<16xf32>
    %646 = vector.shape_cast %645 : vector<16xf32> to vector<1x16xf32>
    %647 = vector.broadcast %646 : vector<1x16xf32> to vector<8x16xf32>
    %648 = arith.mulf %27, %647 : vector<8x16xf32>
    %649 = arith.addf %637, %648 : vector<8x16xf32>
    %c42 = arith.constant 42 : index
    %c0_191 = arith.constant 0 : index
    %650 = vector.load %arg4[%c42, %c0_191] : memref<64x16xf32, #tpu.memory_space<vmem>>, vector<1x16xf32>
    %651 = vector.shape_cast %650 : vector<1x16xf32> to vector<16xf32>
    %652 = vector.shape_cast %651 : vector<16xf32> to vector<1x16xf32>
    %653 = vector.broadcast %652 : vector<1x16xf32> to vector<8x16xf32>
    %654 = arith.mulf %34, %653 : vector<8x16xf32>
    %655 = arith.addf %643, %654 : vector<8x16xf32>
    %c42_192 = arith.constant 42 : index
    %c0_193 = arith.constant 0 : index
    %656 = vector.load %arg5[%c42_192, %c0_193] : memref<64x16xf32, #tpu.memory_space<vmem>>, vector<1x16xf32>
    %657 = vector.shape_cast %656 : vector<1x16xf32> to vector<16xf32>
    %658 = vector.shape_cast %657 : vector<16xf32> to vector<1x16xf32>
    %659 = vector.broadcast %658 : vector<1x16xf32> to vector<8x16xf32>
    %660 = arith.mulf %34, %659 : vector<8x16xf32>
    %661 = arith.addf %649, %660 : vector<8x16xf32>
    %c43 = arith.constant 43 : index
    %c0_194 = arith.constant 0 : index
    %662 = vector.load %arg4[%c43, %c0_194] : memref<64x16xf32, #tpu.memory_space<vmem>>, vector<1x16xf32>
    %663 = vector.shape_cast %662 : vector<1x16xf32> to vector<16xf32>
    %664 = vector.shape_cast %663 : vector<16xf32> to vector<1x16xf32>
    %665 = vector.broadcast %664 : vector<1x16xf32> to vector<8x16xf32>
    %666 = arith.mulf %41, %665 : vector<8x16xf32>
    %667 = arith.addf %655, %666 : vector<8x16xf32>
    %c43_195 = arith.constant 43 : index
    %c0_196 = arith.constant 0 : index
    %668 = vector.load %arg5[%c43_195, %c0_196] : memref<64x16xf32, #tpu.memory_space<vmem>>, vector<1x16xf32>
    %669 = vector.shape_cast %668 : vector<1x16xf32> to vector<16xf32>
    %670 = vector.shape_cast %669 : vector<16xf32> to vector<1x16xf32>
    %671 = vector.broadcast %670 : vector<1x16xf32> to vector<8x16xf32>
    %672 = arith.mulf %41, %671 : vector<8x16xf32>
    %673 = arith.addf %661, %672 : vector<8x16xf32>
    %c44 = arith.constant 44 : index
    %c0_197 = arith.constant 0 : index
    %674 = vector.load %arg4[%c44, %c0_197] : memref<64x16xf32, #tpu.memory_space<vmem>>, vector<1x16xf32>
    %675 = vector.shape_cast %674 : vector<1x16xf32> to vector<16xf32>
    %676 = vector.shape_cast %675 : vector<16xf32> to vector<1x16xf32>
    %677 = vector.broadcast %676 : vector<1x16xf32> to vector<8x16xf32>
    %678 = arith.mulf %48, %677 : vector<8x16xf32>
    %679 = arith.addf %667, %678 : vector<8x16xf32>
    %c44_198 = arith.constant 44 : index
    %c0_199 = arith.constant 0 : index
    %680 = vector.load %arg5[%c44_198, %c0_199] : memref<64x16xf32, #tpu.memory_space<vmem>>, vector<1x16xf32>
    %681 = vector.shape_cast %680 : vector<1x16xf32> to vector<16xf32>
    %682 = vector.shape_cast %681 : vector<16xf32> to vector<1x16xf32>
    %683 = vector.broadcast %682 : vector<1x16xf32> to vector<8x16xf32>
    %684 = arith.mulf %48, %683 : vector<8x16xf32>
    %685 = arith.addf %673, %684 : vector<8x16xf32>
    %c45 = arith.constant 45 : index
    %c0_200 = arith.constant 0 : index
    %686 = vector.load %arg4[%c45, %c0_200] : memref<64x16xf32, #tpu.memory_space<vmem>>, vector<1x16xf32>
    %687 = vector.shape_cast %686 : vector<1x16xf32> to vector<16xf32>
    %688 = vector.shape_cast %687 : vector<16xf32> to vector<1x16xf32>
    %689 = vector.broadcast %688 : vector<1x16xf32> to vector<8x16xf32>
    %690 = arith.mulf %55, %689 : vector<8x16xf32>
    %691 = arith.addf %679, %690 : vector<8x16xf32>
    %c45_201 = arith.constant 45 : index
    %c0_202 = arith.constant 0 : index
    %692 = vector.load %arg5[%c45_201, %c0_202] : memref<64x16xf32, #tpu.memory_space<vmem>>, vector<1x16xf32>
    %693 = vector.shape_cast %692 : vector<1x16xf32> to vector<16xf32>
    %694 = vector.shape_cast %693 : vector<16xf32> to vector<1x16xf32>
    %695 = vector.broadcast %694 : vector<1x16xf32> to vector<8x16xf32>
    %696 = arith.mulf %55, %695 : vector<8x16xf32>
    %697 = arith.addf %685, %696 : vector<8x16xf32>
    %c46 = arith.constant 46 : index
    %c0_203 = arith.constant 0 : index
    %698 = vector.load %arg4[%c46, %c0_203] : memref<64x16xf32, #tpu.memory_space<vmem>>, vector<1x16xf32>
    %699 = vector.shape_cast %698 : vector<1x16xf32> to vector<16xf32>
    %700 = vector.shape_cast %699 : vector<16xf32> to vector<1x16xf32>
    %701 = vector.broadcast %700 : vector<1x16xf32> to vector<8x16xf32>
    %702 = arith.mulf %62, %701 : vector<8x16xf32>
    %703 = arith.addf %691, %702 : vector<8x16xf32>
    %c46_204 = arith.constant 46 : index
    %c0_205 = arith.constant 0 : index
    %704 = vector.load %arg5[%c46_204, %c0_205] : memref<64x16xf32, #tpu.memory_space<vmem>>, vector<1x16xf32>
    %705 = vector.shape_cast %704 : vector<1x16xf32> to vector<16xf32>
    %706 = vector.shape_cast %705 : vector<16xf32> to vector<1x16xf32>
    %707 = vector.broadcast %706 : vector<1x16xf32> to vector<8x16xf32>
    %708 = arith.mulf %62, %707 : vector<8x16xf32>
    %709 = arith.addf %697, %708 : vector<8x16xf32>
    %c47 = arith.constant 47 : index
    %c0_206 = arith.constant 0 : index
    %710 = vector.load %arg4[%c47, %c0_206] : memref<64x16xf32, #tpu.memory_space<vmem>>, vector<1x16xf32>
    %711 = vector.shape_cast %710 : vector<1x16xf32> to vector<16xf32>
    %712 = vector.shape_cast %711 : vector<16xf32> to vector<1x16xf32>
    %713 = vector.broadcast %712 : vector<1x16xf32> to vector<8x16xf32>
    %714 = arith.mulf %69, %713 : vector<8x16xf32>
    %715 = arith.addf %703, %714 : vector<8x16xf32>
    %c47_207 = arith.constant 47 : index
    %c0_208 = arith.constant 0 : index
    %716 = vector.load %arg5[%c47_207, %c0_208] : memref<64x16xf32, #tpu.memory_space<vmem>>, vector<1x16xf32>
    %717 = vector.shape_cast %716 : vector<1x16xf32> to vector<16xf32>
    %718 = vector.shape_cast %717 : vector<16xf32> to vector<1x16xf32>
    %719 = vector.broadcast %718 : vector<1x16xf32> to vector<8x16xf32>
    %720 = arith.mulf %69, %719 : vector<8x16xf32>
    %721 = arith.addf %709, %720 : vector<8x16xf32>
    %722 = arith.mulf %623, %715 : vector<8x16xf32>
    %723 = arith.addf %614, %722 : vector<8x16xf32>
    %724 = arith.mulf %623, %721 : vector<8x16xf32>
    %725 = arith.addf %616, %724 : vector<8x16xf32>
    %cst_209 = arith.constant 6.000000e+00 : f32
    %726 = vector.broadcast %cst_209 : f32 to vector<8x16xf32>
    %727 = arith.subf %6, %726 : vector<8x16xf32>
    %728 = math.absf %727 : vector<8x16xf32>
    %cst_210 = arith.constant 1.000000e+00 : f32
    %729 = vector.broadcast %cst_210 : f32 to vector<8x16xf32>
    %730 = arith.subf %729, %728 : vector<8x16xf32>
    %cst_211 = arith.constant 0.000000e+00 : f32
    %731 = vector.broadcast %cst_211 : f32 to vector<8x16xf32>
    %732 = arith.maximumf %731, %730 : vector<8x16xf32>
    %cst_212 = arith.constant 0.000000e+00 : f32
    %733 = vector.broadcast %cst_212 : f32 to vector<8x16xf32>
    %cst_213 = arith.constant 0.000000e+00 : f32
    %734 = vector.broadcast %cst_213 : f32 to vector<8x16xf32>
    %c48 = arith.constant 48 : index
    %c0_214 = arith.constant 0 : index
    %735 = vector.load %arg4[%c48, %c0_214] : memref<64x16xf32, #tpu.memory_space<vmem>>, vector<1x16xf32>
    %736 = vector.shape_cast %735 : vector<1x16xf32> to vector<16xf32>
    %737 = vector.shape_cast %736 : vector<16xf32> to vector<1x16xf32>
    %738 = vector.broadcast %737 : vector<1x16xf32> to vector<8x16xf32>
    %739 = arith.mulf %20, %738 : vector<8x16xf32>
    %740 = arith.addf %733, %739 : vector<8x16xf32>
    %c48_215 = arith.constant 48 : index
    %c0_216 = arith.constant 0 : index
    %741 = vector.load %arg5[%c48_215, %c0_216] : memref<64x16xf32, #tpu.memory_space<vmem>>, vector<1x16xf32>
    %742 = vector.shape_cast %741 : vector<1x16xf32> to vector<16xf32>
    %743 = vector.shape_cast %742 : vector<16xf32> to vector<1x16xf32>
    %744 = vector.broadcast %743 : vector<1x16xf32> to vector<8x16xf32>
    %745 = arith.mulf %20, %744 : vector<8x16xf32>
    %746 = arith.addf %734, %745 : vector<8x16xf32>
    %c49 = arith.constant 49 : index
    %c0_217 = arith.constant 0 : index
    %747 = vector.load %arg4[%c49, %c0_217] : memref<64x16xf32, #tpu.memory_space<vmem>>, vector<1x16xf32>
    %748 = vector.shape_cast %747 : vector<1x16xf32> to vector<16xf32>
    %749 = vector.shape_cast %748 : vector<16xf32> to vector<1x16xf32>
    %750 = vector.broadcast %749 : vector<1x16xf32> to vector<8x16xf32>
    %751 = arith.mulf %27, %750 : vector<8x16xf32>
    %752 = arith.addf %740, %751 : vector<8x16xf32>
    %c49_218 = arith.constant 49 : index
    %c0_219 = arith.constant 0 : index
    %753 = vector.load %arg5[%c49_218, %c0_219] : memref<64x16xf32, #tpu.memory_space<vmem>>, vector<1x16xf32>
    %754 = vector.shape_cast %753 : vector<1x16xf32> to vector<16xf32>
    %755 = vector.shape_cast %754 : vector<16xf32> to vector<1x16xf32>
    %756 = vector.broadcast %755 : vector<1x16xf32> to vector<8x16xf32>
    %757 = arith.mulf %27, %756 : vector<8x16xf32>
    %758 = arith.addf %746, %757 : vector<8x16xf32>
    %c50 = arith.constant 50 : index
    %c0_220 = arith.constant 0 : index
    %759 = vector.load %arg4[%c50, %c0_220] : memref<64x16xf32, #tpu.memory_space<vmem>>, vector<1x16xf32>
    %760 = vector.shape_cast %759 : vector<1x16xf32> to vector<16xf32>
    %761 = vector.shape_cast %760 : vector<16xf32> to vector<1x16xf32>
    %762 = vector.broadcast %761 : vector<1x16xf32> to vector<8x16xf32>
    %763 = arith.mulf %34, %762 : vector<8x16xf32>
    %764 = arith.addf %752, %763 : vector<8x16xf32>
    %c50_221 = arith.constant 50 : index
    %c0_222 = arith.constant 0 : index
    %765 = vector.load %arg5[%c50_221, %c0_222] : memref<64x16xf32, #tpu.memory_space<vmem>>, vector<1x16xf32>
    %766 = vector.shape_cast %765 : vector<1x16xf32> to vector<16xf32>
    %767 = vector.shape_cast %766 : vector<16xf32> to vector<1x16xf32>
    %768 = vector.broadcast %767 : vector<1x16xf32> to vector<8x16xf32>
    %769 = arith.mulf %34, %768 : vector<8x16xf32>
    %770 = arith.addf %758, %769 : vector<8x16xf32>
    %c51 = arith.constant 51 : index
    %c0_223 = arith.constant 0 : index
    %771 = vector.load %arg4[%c51, %c0_223] : memref<64x16xf32, #tpu.memory_space<vmem>>, vector<1x16xf32>
    %772 = vector.shape_cast %771 : vector<1x16xf32> to vector<16xf32>
    %773 = vector.shape_cast %772 : vector<16xf32> to vector<1x16xf32>
    %774 = vector.broadcast %773 : vector<1x16xf32> to vector<8x16xf32>
    %775 = arith.mulf %41, %774 : vector<8x16xf32>
    %776 = arith.addf %764, %775 : vector<8x16xf32>
    %c51_224 = arith.constant 51 : index
    %c0_225 = arith.constant 0 : index
    %777 = vector.load %arg5[%c51_224, %c0_225] : memref<64x16xf32, #tpu.memory_space<vmem>>, vector<1x16xf32>
    %778 = vector.shape_cast %777 : vector<1x16xf32> to vector<16xf32>
    %779 = vector.shape_cast %778 : vector<16xf32> to vector<1x16xf32>
    %780 = vector.broadcast %779 : vector<1x16xf32> to vector<8x16xf32>
    %781 = arith.mulf %41, %780 : vector<8x16xf32>
    %782 = arith.addf %770, %781 : vector<8x16xf32>
    %c52 = arith.constant 52 : index
    %c0_226 = arith.constant 0 : index
    %783 = vector.load %arg4[%c52, %c0_226] : memref<64x16xf32, #tpu.memory_space<vmem>>, vector<1x16xf32>
    %784 = vector.shape_cast %783 : vector<1x16xf32> to vector<16xf32>
    %785 = vector.shape_cast %784 : vector<16xf32> to vector<1x16xf32>
    %786 = vector.broadcast %785 : vector<1x16xf32> to vector<8x16xf32>
    %787 = arith.mulf %48, %786 : vector<8x16xf32>
    %788 = arith.addf %776, %787 : vector<8x16xf32>
    %c52_227 = arith.constant 52 : index
    %c0_228 = arith.constant 0 : index
    %789 = vector.load %arg5[%c52_227, %c0_228] : memref<64x16xf32, #tpu.memory_space<vmem>>, vector<1x16xf32>
    %790 = vector.shape_cast %789 : vector<1x16xf32> to vector<16xf32>
    %791 = vector.shape_cast %790 : vector<16xf32> to vector<1x16xf32>
    %792 = vector.broadcast %791 : vector<1x16xf32> to vector<8x16xf32>
    %793 = arith.mulf %48, %792 : vector<8x16xf32>
    %794 = arith.addf %782, %793 : vector<8x16xf32>
    %c53 = arith.constant 53 : index
    %c0_229 = arith.constant 0 : index
    %795 = vector.load %arg4[%c53, %c0_229] : memref<64x16xf32, #tpu.memory_space<vmem>>, vector<1x16xf32>
    %796 = vector.shape_cast %795 : vector<1x16xf32> to vector<16xf32>
    %797 = vector.shape_cast %796 : vector<16xf32> to vector<1x16xf32>
    %798 = vector.broadcast %797 : vector<1x16xf32> to vector<8x16xf32>
    %799 = arith.mulf %55, %798 : vector<8x16xf32>
    %800 = arith.addf %788, %799 : vector<8x16xf32>
    %c53_230 = arith.constant 53 : index
    %c0_231 = arith.constant 0 : index
    %801 = vector.load %arg5[%c53_230, %c0_231] : memref<64x16xf32, #tpu.memory_space<vmem>>, vector<1x16xf32>
    %802 = vector.shape_cast %801 : vector<1x16xf32> to vector<16xf32>
    %803 = vector.shape_cast %802 : vector<16xf32> to vector<1x16xf32>
    %804 = vector.broadcast %803 : vector<1x16xf32> to vector<8x16xf32>
    %805 = arith.mulf %55, %804 : vector<8x16xf32>
    %806 = arith.addf %794, %805 : vector<8x16xf32>
    %c54 = arith.constant 54 : index
    %c0_232 = arith.constant 0 : index
    %807 = vector.load %arg4[%c54, %c0_232] : memref<64x16xf32, #tpu.memory_space<vmem>>, vector<1x16xf32>
    %808 = vector.shape_cast %807 : vector<1x16xf32> to vector<16xf32>
    %809 = vector.shape_cast %808 : vector<16xf32> to vector<1x16xf32>
    %810 = vector.broadcast %809 : vector<1x16xf32> to vector<8x16xf32>
    %811 = arith.mulf %62, %810 : vector<8x16xf32>
    %812 = arith.addf %800, %811 : vector<8x16xf32>
    %c54_233 = arith.constant 54 : index
    %c0_234 = arith.constant 0 : index
    %813 = vector.load %arg5[%c54_233, %c0_234] : memref<64x16xf32, #tpu.memory_space<vmem>>, vector<1x16xf32>
    %814 = vector.shape_cast %813 : vector<1x16xf32> to vector<16xf32>
    %815 = vector.shape_cast %814 : vector<16xf32> to vector<1x16xf32>
    %816 = vector.broadcast %815 : vector<1x16xf32> to vector<8x16xf32>
    %817 = arith.mulf %62, %816 : vector<8x16xf32>
    %818 = arith.addf %806, %817 : vector<8x16xf32>
    %c55 = arith.constant 55 : index
    %c0_235 = arith.constant 0 : index
    %819 = vector.load %arg4[%c55, %c0_235] : memref<64x16xf32, #tpu.memory_space<vmem>>, vector<1x16xf32>
    %820 = vector.shape_cast %819 : vector<1x16xf32> to vector<16xf32>
    %821 = vector.shape_cast %820 : vector<16xf32> to vector<1x16xf32>
    %822 = vector.broadcast %821 : vector<1x16xf32> to vector<8x16xf32>
    %823 = arith.mulf %69, %822 : vector<8x16xf32>
    %824 = arith.addf %812, %823 : vector<8x16xf32>
    %c55_236 = arith.constant 55 : index
    %c0_237 = arith.constant 0 : index
    %825 = vector.load %arg5[%c55_236, %c0_237] : memref<64x16xf32, #tpu.memory_space<vmem>>, vector<1x16xf32>
    %826 = vector.shape_cast %825 : vector<1x16xf32> to vector<16xf32>
    %827 = vector.shape_cast %826 : vector<16xf32> to vector<1x16xf32>
    %828 = vector.broadcast %827 : vector<1x16xf32> to vector<8x16xf32>
    %829 = arith.mulf %69, %828 : vector<8x16xf32>
    %830 = arith.addf %818, %829 : vector<8x16xf32>
    %831 = arith.mulf %732, %824 : vector<8x16xf32>
    %832 = arith.addf %723, %831 : vector<8x16xf32>
    %833 = arith.mulf %732, %830 : vector<8x16xf32>
    %834 = arith.addf %725, %833 : vector<8x16xf32>
    %cst_238 = arith.constant 7.000000e+00 : f32
    %835 = vector.broadcast %cst_238 : f32 to vector<8x16xf32>
    %836 = arith.subf %6, %835 : vector<8x16xf32>
    %837 = math.absf %836 : vector<8x16xf32>
    %cst_239 = arith.constant 1.000000e+00 : f32
    %838 = vector.broadcast %cst_239 : f32 to vector<8x16xf32>
    %839 = arith.subf %838, %837 : vector<8x16xf32>
    %cst_240 = arith.constant 0.000000e+00 : f32
    %840 = vector.broadcast %cst_240 : f32 to vector<8x16xf32>
    %841 = arith.maximumf %840, %839 : vector<8x16xf32>
    %cst_241 = arith.constant 0.000000e+00 : f32
    %842 = vector.broadcast %cst_241 : f32 to vector<8x16xf32>
    %cst_242 = arith.constant 0.000000e+00 : f32
    %843 = vector.broadcast %cst_242 : f32 to vector<8x16xf32>
    %c56 = arith.constant 56 : index
    %c0_243 = arith.constant 0 : index
    %844 = vector.load %arg4[%c56, %c0_243] : memref<64x16xf32, #tpu.memory_space<vmem>>, vector<1x16xf32>
    %845 = vector.shape_cast %844 : vector<1x16xf32> to vector<16xf32>
    %846 = vector.shape_cast %845 : vector<16xf32> to vector<1x16xf32>
    %847 = vector.broadcast %846 : vector<1x16xf32> to vector<8x16xf32>
    %848 = arith.mulf %20, %847 : vector<8x16xf32>
    %849 = arith.addf %842, %848 : vector<8x16xf32>
    %c56_244 = arith.constant 56 : index
    %c0_245 = arith.constant 0 : index
    %850 = vector.load %arg5[%c56_244, %c0_245] : memref<64x16xf32, #tpu.memory_space<vmem>>, vector<1x16xf32>
    %851 = vector.shape_cast %850 : vector<1x16xf32> to vector<16xf32>
    %852 = vector.shape_cast %851 : vector<16xf32> to vector<1x16xf32>
    %853 = vector.broadcast %852 : vector<1x16xf32> to vector<8x16xf32>
    %854 = arith.mulf %20, %853 : vector<8x16xf32>
    %855 = arith.addf %843, %854 : vector<8x16xf32>
    %c57 = arith.constant 57 : index
    %c0_246 = arith.constant 0 : index
    %856 = vector.load %arg4[%c57, %c0_246] : memref<64x16xf32, #tpu.memory_space<vmem>>, vector<1x16xf32>
    %857 = vector.shape_cast %856 : vector<1x16xf32> to vector<16xf32>
    %858 = vector.shape_cast %857 : vector<16xf32> to vector<1x16xf32>
    %859 = vector.broadcast %858 : vector<1x16xf32> to vector<8x16xf32>
    %860 = arith.mulf %27, %859 : vector<8x16xf32>
    %861 = arith.addf %849, %860 : vector<8x16xf32>
    %c57_247 = arith.constant 57 : index
    %c0_248 = arith.constant 0 : index
    %862 = vector.load %arg5[%c57_247, %c0_248] : memref<64x16xf32, #tpu.memory_space<vmem>>, vector<1x16xf32>
    %863 = vector.shape_cast %862 : vector<1x16xf32> to vector<16xf32>
    %864 = vector.shape_cast %863 : vector<16xf32> to vector<1x16xf32>
    %865 = vector.broadcast %864 : vector<1x16xf32> to vector<8x16xf32>
    %866 = arith.mulf %27, %865 : vector<8x16xf32>
    %867 = arith.addf %855, %866 : vector<8x16xf32>
    %c58 = arith.constant 58 : index
    %c0_249 = arith.constant 0 : index
    %868 = vector.load %arg4[%c58, %c0_249] : memref<64x16xf32, #tpu.memory_space<vmem>>, vector<1x16xf32>
    %869 = vector.shape_cast %868 : vector<1x16xf32> to vector<16xf32>
    %870 = vector.shape_cast %869 : vector<16xf32> to vector<1x16xf32>
    %871 = vector.broadcast %870 : vector<1x16xf32> to vector<8x16xf32>
    %872 = arith.mulf %34, %871 : vector<8x16xf32>
    %873 = arith.addf %861, %872 : vector<8x16xf32>
    %c58_250 = arith.constant 58 : index
    %c0_251 = arith.constant 0 : index
    %874 = vector.load %arg5[%c58_250, %c0_251] : memref<64x16xf32, #tpu.memory_space<vmem>>, vector<1x16xf32>
    %875 = vector.shape_cast %874 : vector<1x16xf32> to vector<16xf32>
    %876 = vector.shape_cast %875 : vector<16xf32> to vector<1x16xf32>
    %877 = vector.broadcast %876 : vector<1x16xf32> to vector<8x16xf32>
    %878 = arith.mulf %34, %877 : vector<8x16xf32>
    %879 = arith.addf %867, %878 : vector<8x16xf32>
    %c59 = arith.constant 59 : index
    %c0_252 = arith.constant 0 : index
    %880 = vector.load %arg4[%c59, %c0_252] : memref<64x16xf32, #tpu.memory_space<vmem>>, vector<1x16xf32>
    %881 = vector.shape_cast %880 : vector<1x16xf32> to vector<16xf32>
    %882 = vector.shape_cast %881 : vector<16xf32> to vector<1x16xf32>
    %883 = vector.broadcast %882 : vector<1x16xf32> to vector<8x16xf32>
    %884 = arith.mulf %41, %883 : vector<8x16xf32>
    %885 = arith.addf %873, %884 : vector<8x16xf32>
    %c59_253 = arith.constant 59 : index
    %c0_254 = arith.constant 0 : index
    %886 = vector.load %arg5[%c59_253, %c0_254] : memref<64x16xf32, #tpu.memory_space<vmem>>, vector<1x16xf32>
    %887 = vector.shape_cast %886 : vector<1x16xf32> to vector<16xf32>
    %888 = vector.shape_cast %887 : vector<16xf32> to vector<1x16xf32>
    %889 = vector.broadcast %888 : vector<1x16xf32> to vector<8x16xf32>
    %890 = arith.mulf %41, %889 : vector<8x16xf32>
    %891 = arith.addf %879, %890 : vector<8x16xf32>
    %c60 = arith.constant 60 : index
    %c0_255 = arith.constant 0 : index
    %892 = vector.load %arg4[%c60, %c0_255] : memref<64x16xf32, #tpu.memory_space<vmem>>, vector<1x16xf32>
    %893 = vector.shape_cast %892 : vector<1x16xf32> to vector<16xf32>
    %894 = vector.shape_cast %893 : vector<16xf32> to vector<1x16xf32>
    %895 = vector.broadcast %894 : vector<1x16xf32> to vector<8x16xf32>
    %896 = arith.mulf %48, %895 : vector<8x16xf32>
    %897 = arith.addf %885, %896 : vector<8x16xf32>
    %c60_256 = arith.constant 60 : index
    %c0_257 = arith.constant 0 : index
    %898 = vector.load %arg5[%c60_256, %c0_257] : memref<64x16xf32, #tpu.memory_space<vmem>>, vector<1x16xf32>
    %899 = vector.shape_cast %898 : vector<1x16xf32> to vector<16xf32>
    %900 = vector.shape_cast %899 : vector<16xf32> to vector<1x16xf32>
    %901 = vector.broadcast %900 : vector<1x16xf32> to vector<8x16xf32>
    %902 = arith.mulf %48, %901 : vector<8x16xf32>
    %903 = arith.addf %891, %902 : vector<8x16xf32>
    %c61 = arith.constant 61 : index
    %c0_258 = arith.constant 0 : index
    %904 = vector.load %arg4[%c61, %c0_258] : memref<64x16xf32, #tpu.memory_space<vmem>>, vector<1x16xf32>
    %905 = vector.shape_cast %904 : vector<1x16xf32> to vector<16xf32>
    %906 = vector.shape_cast %905 : vector<16xf32> to vector<1x16xf32>
    %907 = vector.broadcast %906 : vector<1x16xf32> to vector<8x16xf32>
    %908 = arith.mulf %55, %907 : vector<8x16xf32>
    %909 = arith.addf %897, %908 : vector<8x16xf32>
    %c61_259 = arith.constant 61 : index
    %c0_260 = arith.constant 0 : index
    %910 = vector.load %arg5[%c61_259, %c0_260] : memref<64x16xf32, #tpu.memory_space<vmem>>, vector<1x16xf32>
    %911 = vector.shape_cast %910 : vector<1x16xf32> to vector<16xf32>
    %912 = vector.shape_cast %911 : vector<16xf32> to vector<1x16xf32>
    %913 = vector.broadcast %912 : vector<1x16xf32> to vector<8x16xf32>
    %914 = arith.mulf %55, %913 : vector<8x16xf32>
    %915 = arith.addf %903, %914 : vector<8x16xf32>
    %c62 = arith.constant 62 : index
    %c0_261 = arith.constant 0 : index
    %916 = vector.load %arg4[%c62, %c0_261] : memref<64x16xf32, #tpu.memory_space<vmem>>, vector<1x16xf32>
    %917 = vector.shape_cast %916 : vector<1x16xf32> to vector<16xf32>
    %918 = vector.shape_cast %917 : vector<16xf32> to vector<1x16xf32>
    %919 = vector.broadcast %918 : vector<1x16xf32> to vector<8x16xf32>
    %920 = arith.mulf %62, %919 : vector<8x16xf32>
    %921 = arith.addf %909, %920 : vector<8x16xf32>
    %c62_262 = arith.constant 62 : index
    %c0_263 = arith.constant 0 : index
    %922 = vector.load %arg5[%c62_262, %c0_263] : memref<64x16xf32, #tpu.memory_space<vmem>>, vector<1x16xf32>
    %923 = vector.shape_cast %922 : vector<1x16xf32> to vector<16xf32>
    %924 = vector.shape_cast %923 : vector<16xf32> to vector<1x16xf32>
    %925 = vector.broadcast %924 : vector<1x16xf32> to vector<8x16xf32>
    %926 = arith.mulf %62, %925 : vector<8x16xf32>
    %927 = arith.addf %915, %926 : vector<8x16xf32>
    %c63 = arith.constant 63 : index
    %c0_264 = arith.constant 0 : index
    %928 = vector.load %arg4[%c63, %c0_264] : memref<64x16xf32, #tpu.memory_space<vmem>>, vector<1x16xf32>
    %929 = vector.shape_cast %928 : vector<1x16xf32> to vector<16xf32>
    %930 = vector.shape_cast %929 : vector<16xf32> to vector<1x16xf32>
    %931 = vector.broadcast %930 : vector<1x16xf32> to vector<8x16xf32>
    %932 = arith.mulf %69, %931 : vector<8x16xf32>
    %933 = arith.addf %921, %932 : vector<8x16xf32>
    %c63_265 = arith.constant 63 : index
    %c0_266 = arith.constant 0 : index
    %934 = vector.load %arg5[%c63_265, %c0_266] : memref<64x16xf32, #tpu.memory_space<vmem>>, vector<1x16xf32>
    %935 = vector.shape_cast %934 : vector<1x16xf32> to vector<16xf32>
    %936 = vector.shape_cast %935 : vector<16xf32> to vector<1x16xf32>
    %937 = vector.broadcast %936 : vector<1x16xf32> to vector<8x16xf32>
    %938 = arith.mulf %69, %937 : vector<8x16xf32>
    %939 = arith.addf %927, %938 : vector<8x16xf32>
    %940 = arith.mulf %841, %933 : vector<8x16xf32>
    %941 = arith.addf %832, %940 : vector<8x16xf32>
    %942 = arith.mulf %841, %939 : vector<8x16xf32>
    %943 = arith.addf %834, %942 : vector<8x16xf32>
    %c0_267 = arith.constant 0 : index
    %c0_268 = arith.constant 0 : index
    %944 = vector.load %arg6[%c0_267, %c0_268] : memref<8x16xf32, #tpu.memory_space<vmem>>, vector<8x16xf32>
    tpu.vector_store %arg6[%c0_267, %c0_268], %941 {strides = array<i32>} : memref<8x16xf32, #tpu.memory_space<vmem>>, vector<8x16xf32>,
    %c0_269 = arith.constant 0 : index
    %c0_270 = arith.constant 0 : index
    %945 = vector.load %arg7[%c0_269, %c0_270] : memref<8x16xf32, #tpu.memory_space<vmem>>, vector<8x16xf32>
    tpu.vector_store %arg7[%c0_269, %c0_270], %943 {strides = array<i32>} : memref<8x16xf32, #tpu.memory_space<vmem>>, vector<8x16xf32>,
    return
  }
  func.func @transform_0(%arg0: i32, %arg1: i32) -> (i32, i32) {
    %c0_i32 = arith.constant 0 : i32
    return %arg0, %arg1 : i32, i32
  }
  func.func @transform_1(%arg0: i32, %arg1: i32) -> (i32, i32) {
    %c0_i32 = arith.constant 0 : i32
    return %arg0, %arg1 : i32, i32
  }
  func.func @transform_2(%arg0: i32, %arg1: i32) -> (i32, i32) {
    %c0_i32 = arith.constant 0 : i32
    %c0_i32_0 = arith.constant 0 : i32
    return %c0_i32, %arg1 : i32, i32
  }
  func.func @transform_3(%arg0: i32, %arg1: i32) -> (i32, i32) {
    %c0_i32 = arith.constant 0 : i32
    %c0_i32_0 = arith.constant 0 : i32
    return %c0_i32, %arg1 : i32, i32
  }
  func.func @transform_4(%arg0: i32, %arg1: i32) -> (i32, i32) {
    %c0_i32 = arith.constant 0 : i32
    return %arg0, %arg1 : i32, i32
  }
  func.func @transform_5(%arg0: i32, %arg1: i32) -> (i32, i32) {
    %c0_i32 = arith.constant 0 : i32
    return %arg0, %arg1 : i32, i32
  }
}

</mosaic_0001>

<bundles_post_ra>
// kernel: tpu_custom_call.1
= control target key start
LH: loop header
LB: loop body
LE: loop exit
PB: predicated region body
PF: predicated region fallthrough
CT: control target
= control target key end

     0   :  { %s1727_s18 = smov 0   ;;  %s1729_s19 = smov 0   ;;  %s2356_s0 = inlined_call_operand.vmem [shape: f32[32,16], index: 0, kind: input, shape index: {}]   ;;  %s2357_s1 = inlined_call_operand.vmem [shape: f32[32,16], index: 1, kind: input, shape index: {}]   ;;  %s2358_s2 = inlined_call_operand.vmem [shape: f32[64,16], index: 2, kind: input, shape index: {}]   ;;  %s2359_s3 = inlined_call_operand.vmem [shape: f32[64,16], index: 3, kind: input, shape index: {}]   ;;  %s2360_s4 = inlined_call_operand.vmem [shape: f32[32,16], index: 4, kind: output, shape index: {0}]   ;;  %s2361_s5 = inlined_call_operand.vmem [shape: f32[32,16], index: 5, kind: output, shape index: {1}]  }
   0x1   :  { %s1731_s20 = smov 0  }
   0x2 LB: > { %s28_s21 = sadd.s32 1, %s1691_s19  ;;  %p1500_p0 = scmp.ge.s32.totalorder %s1695_s20, 1  ;;  %s1695_s20 = sphi %s1731_s20, %s16_s20   ;;  %s1691_s19 = sphi %s1729_s19, %s2363_s19   ;;  %s1687_s18 = sphi %s1727_s18, %s2362_s18  }
   0x3   : > { %p30_p1 = scmp.ge.s32.totalorder %s28_s21, 4  ;;  %p242_p2 = scmp.lt.s32.totalorder %s1695_s20, 5 }
   0x5   : > { %s2365_s21 = smov (%p30_p1, %s28_s21), 0  ;;  %p243_p3 = pnand %p1500_p0, %p242_p2 }
   0x6   : > { %p296_p4 = scmp.lt.s32.totalorder (!%p243_p3), %s1687_s18, 3  ;;  %v1512_v22 = vld [vmem:[%s2358_s2] ss:$0 sm:$0xff] (!%p243_p3)  ;;  %v1514_v28 = vld [vmem:[%s2358_s2 + $0x1] ss:$0 sm:$0xff] (!%p243_p3)  ;;  %vm1330_vm0 = vcmask (!%p243_p3), 130048  }
   0x7   : > { %246 = sbr.rel (%p243_p3) target bundleno = 116 (0x74), region = 36  ;;  %v1513_v23 = vld [vmem:[%s2359_s3] ss:$0 sm:$0xff] (!%p243_p3)  ;;  %v1515_v29 = vld [vmem:[%s2359_s3 + $0x1] ss:$0 sm:$0xff] (!%p243_p3) }
   0x8   : > { %v1516_v30 = vld [vmem:[%s2358_s2 + $0x2] ss:$0 sm:$0xff] (!%p243_p3)  ;;  %v1518_v40 = vld [vmem:[%s2358_s2 + $0x3] ss:$0 sm:$0xff] (!%p243_p3)  ;;  %v1520_v45 = vld [vmem:[%s2358_s2 + $0x4] ss:$0 sm:$0xff] (!%p243_p3) }
   0x9   : > { %v1517_v35 = vld [vmem:[%s2359_s3 + $0x2] ss:$0 sm:$0xff] (!%p243_p3)  ;;  %v1519_v41 = vld [vmem:[%s2359_s3 + $0x3] ss:$0 sm:$0xff] (!%p243_p3)  ;;  %v1521_v50 = vld [vmem:[%s2359_s3 + $0x4] ss:$0 sm:$0xff] (!%p243_p3) }
   0xa   : > { %v1522_v51 = vld [vmem:[%s2358_s2 + $0x5] ss:$0 sm:$0xff] (!%p243_p3)  ;;  %v1524_v57 = vld [vmem:[%s2358_s2 + $0x6] ss:$0 sm:$0xff] (!%p243_p3) }
   0xb   : > { %v1523_v56 = vld [vmem:[%s2359_s3 + $0x5] ss:$0 sm:$0xff] (!%p243_p3)  ;;  %v1525_v61 = vld [vmem:[%s2359_s3 + $0x6] ss:$0 sm:$0xff] (!%p243_p3) }
   0xe   : > { %s2367_s18 = smov (!%p296_p4, %s1687_s18), 3 }
   0xf   : > { %s1745_s22 = sshll.u32 %s2367_s18, 3 }
  0x10   : > { %s302_s25 = scalar_lea.vmem %s2356_s0, %s1745_s22  ;;  %s309_s28 = scalar_lea.vmem %s2357_s1, %s1745_s22 }
  0x11   : > { %v332_v0 = vld [vmem:[%s302_s25] sm:$0xff]  ;;  %s324_s10 = scalar_lea.vmem %s2360_s4, %s1745_s22  ;;  %s331_s13 = scalar_lea.vmem %s2361_s5, %s1745_s22 }
  0x12   : > { %v336_v1 = vld [vmem:[%s309_s28] sm:$0xff]  ;;  %v333_v2 = vmul.f32 7.0, %v332_v0 }
  0x13   : > { %v337_v3 = vmul.f32 7.0, %v336_v1 }
  0x14   : > { %v334_v5 = vmax.f32 %v333_v2, 0.0 }
  0x15   : > { %v338_v4 = vmax.f32 %v337_v3, 0.0  ;;  %v1529_v3 = vld [vmem:[%s2358_s2 + $0x8] ss:$0 sm:$0xff] }
  0x16   : > { %v1755_v15 = vmin.f32 %v334_v5, 7.0  ;;  %v1531_v5 = vld [vmem:[%s2358_s2 + $0x9] ss:$0 sm:$0xff] }
  0x17   : > { %v339_v6 = vmin.f32 %v338_v4, 7.0  ;;  %v1530_v4 = vld [vmem:[%s2359_s3 + $0x8] ss:$0 sm:$0xff] }
  0x18   : > { %v371_v39 = vand.u32 2147483647, %v1755_v15  ;;  %v1528_v62 = vadd.f32 -1.0, %v1755_v15 }
  0x19   : > { %v340_v7 = vand.u32 2147483647, %v339_v6  ;;  %v1505_v8 = vadd.f32 -1.0, %v339_v6  ;;  %v1506_v9 = vadd.f32 -2.0, %v339_v6  ;;  %v1507_v10 = vadd.f32 -3.0, %v339_v6 }
  0x1a   : > { %v1508_v11 = vadd.f32 -4.0, %v339_v6  ;;  %v1509_v12 = vadd.f32 -5.0, %v339_v6  ;;  %v1510_v13 = vadd.f32 -6.0, %v339_v6  ;;  %v1511_v14 = vadd.f32 -7.0, %v339_v6 }
  0x1b   : > { %v341_v16 = vsub.f32 1.0, %v340_v7  ;;  %v344_v17 = vand.u32 2147483647, %v1505_v8  ;;  %v348_v18 = vand.u32 2147483647, %v1506_v9  ;;  %v1797_v47 = vsub.f32 1.0, %v371_v39 }
  0x1c   : > { %v352_v19 = vand.u32 2147483647, %v1507_v10  ;;  %v356_v20 = vand.u32 2147483647, %v1508_v11  ;;  %v360_v21 = vand.u32 2147483647, %v1509_v12 }
  0x1d   : > { %v1763_v24 = vmax.f32 %v341_v16, 0.0  ;;  %v345_v25 = vsub.f32 1.0, %v344_v17  ;;  %v349_v26 = vsub.f32 1.0, %v348_v18  ;;  %v364_v27 = vand.u32 2147483647, %v1510_v13 }
  0x1e   : > { %v353_v31 = vsub.f32 1.0, %v352_v19  ;;  %v357_v32 = vsub.f32 1.0, %v356_v20  ;;  %v361_v33 = vsub.f32 1.0, %v360_v21  ;;  %v368_v34 = vand.u32 2147483647, %v1511_v14 }
  0x1f   : > { %v1777_v36 = vmax.f32 %v345_v25, 0.0  ;;  %v1779_v37 = vmax.f32 %v349_v26, 0.0  ;;  %v365_v38 = vsub.f32 1.0, %v364_v27  ;;  %v379_v48 = vmul.f32 %v1512_v22, %v1763_v24  ;;  %v1532_v10 = vld [vmem:[%s2359_s3 + $0x9] ss:$0 sm:$0xff] }
  0x20   : > { %v1788_v42 = vmax.f32 %v353_v31, 0.0  ;;  %v1790_v43 = vmax.f32 %v357_v32, 0.0  ;;  %v369_v44 = vsub.f32 1.0, %v368_v34  ;;  %v1795_v46 = vmax.f32 %v361_v33, 0.0  ;;  %v1533_v11 = vld [vmem:[%s2358_s2 + $0xa] ss:$0 sm:$0xff] }
  0x21   : > { %v386_v49 = vmul.f32 %v1513_v23, %v1763_v24  ;;  %v1807_v52 = vmax.f32 %v365_v38, 0.0  ;;  %v393_v53 = vmul.f32 %v1514_v28, %v1777_v36  ;;  %v400_v54 = vmul.f32 %v1515_v29, %v1777_v36  ;;  %v1534_v17 = vld [vmem:[%s2359_s3 + $0xa] ss:$0 sm:$0xff]  ;;  %v1535_v18 = vld [vmem:[%s2358_s2 + $0xb] ss:$0 sm:$0xff] }
  0x22   : > { %v407_v55 = vmul.f32 %v1516_v30, %v1779_v37  ;;  %v1818_v58 = vmax.f32 %v369_v44, 0.0  ;;  %v373_v59 = vmax.f32 %v1797_v47, 0.0  ;;  %v414_v60 = vmul.f32 %v1517_v35, %v1779_v37  ;;  %v1536_v23 = vld [vmem:[%s2359_s3 + $0xb] ss:$0 sm:$0xff]  ;;  %v1526_v27 = vld [vmem:[%s2358_s2 + $0x7] ss:$0 sm:$0xff] }
  0x23   : > { %v394_v63 = vadd.f32 %v393_v53, %v379_v48  ;;  %v401_v0 = vadd.f32 %v400_v54, %v386_v49  ;;  %v421_v1 = vmul.f32 %v1518_v40, %v1788_v42  ;;  %v428_v2 = vmul.f32 %v1519_v41, %v1788_v42  ;;  %v1527_v28 = vld [vmem:[%s2359_s3 + $0x7] ss:$0 sm:$0xff]  ;;  %v1537_v31 = vld [vmem:[%s2358_s2 + $0xc] ss:$0 sm:$0xff]  ;;  %v1540_v48 = vld [vmem:[%s2359_s3 + $0xd] ss:$0 sm:$0xff] }
  0x24   : > { %v435_v6 = vmul.f32 %v1520_v45, %v1790_v43  ;;  %v442_v7 = vmul.f32 %v1521_v50, %v1790_v43  ;;  %v449_v8 = vmul.f32 %v1522_v51, %v1795_v46  ;;  %v456_v9 = vmul.f32 %v1523_v56, %v1795_v46  ;;  %v1538_v38 = vld [vmem:[%s2359_s3 + $0xc] ss:$0 sm:$0xff]  ;;  %v1539_v45 = vld [vmem:[%s2358_s2 + $0xd] ss:$0 sm:$0xff]  ;;  %v1541_v54 = vld [vmem:[%s2358_s2 + $0xe] ss:$0 sm:$0xff] }
  0x25   : > { %v408_v12 = vadd.f32 %v407_v55, %v394_v63  ;;  %v415_v13 = vadd.f32 %v414_v60, %v401_v0  ;;  %v463_v14 = vmul.f32 %v1524_v57, %v1807_v52  ;;  %v470_v16 = vmul.f32 %v1525_v61, %v1807_v52  ;;  %v1542_v61 = vld [vmem:[%s2359_s3 + $0xe] ss:$0 sm:$0xff]  ;;  %v1546_v63 = vld [vmem:[%s2358_s2 + $0x10] ss:$0 sm:$0xff] }
  0x26   : > { %v491_v19 = vand.u32 2147483647, %v1528_v62  ;;  %v499_v20 = vmul.f32 %v1529_v3, %v1763_v24  ;;  %v506_v21 = vmul.f32 %v1530_v4, %v1763_v24  ;;  %v513_v22 = vmul.f32 %v1531_v5, %v1777_v36  ;;  %v1543_v62 = vld [vmem:[%s2358_s2 + $0xf] ss:$0 sm:$0xff]  ;;  %v1547_v5 = vld [vmem:[%s2359_s3 + $0x10] ss:$0 sm:$0xff] }
  0x27   : > { %v422_v25 = vadd.f32 %v421_v1, %v408_v12  ;;  %v429_v26 = vadd.f32 %v428_v2, %v415_v13  ;;  %v520_v29 = vmul.f32 %v1532_v10, %v1777_v36  ;;  %v527_v30 = vmul.f32 %v1533_v11, %v1779_v37  ;;  %v1544_v4 = vld [vmem:[%s2359_s3 + $0xf] ss:$0 sm:$0xff]  ;;  %v1548_v10 = vld [vmem:[%s2358_s2 + $0x11] ss:$0 sm:$0xff] }
  0x28   : > { %v1872_v32 = vsub.f32 1.0, %v491_v19  ;;  %v514_v33 = vadd.f32 %v513_v22, %v499_v20  ;;  %v534_v34 = vmul.f32 %v1534_v17, %v1779_v37  ;;  %v541_v35 = vmul.f32 %v1535_v18, %v1788_v42  ;;  %v1549_v11 = vld [vmem:[%s2359_s3 + $0x11] ss:$0 sm:$0xff]  ;;  %v1551_v22 = vld [vmem:[%s2359_s3 + $0x12] ss:$0 sm:$0xff] }
  0x29   : > { %v436_v39 = vadd.f32 %v435_v6, %v422_v25  ;;  %v443_v40 = vadd.f32 %v442_v7, %v429_v26  ;;  %v521_v41 = vadd.f32 %v520_v29, %v506_v21  ;;  %v548_v44 = vmul.f32 %v1536_v23, %v1788_v42  ;;  %v1553_v29 = vld [vmem:[%s2359_s3 + $0x13] ss:$0 sm:$0xff] }
  0x2a   : > { %v477_v49 = vmul.f32 %v1526_v27, %v1818_v58  ;;  %v484_v50 = vmul.f32 %v1527_v28, %v1818_v58  ;;  %v528_v51 = vadd.f32 %v527_v30, %v514_v33  ;;  %v555_v53 = vmul.f32 %v1537_v31, %v1790_v43  ;;  %v1552_v28 = vld [vmem:[%s2358_s2 + $0x13] ss:$0 sm:$0xff] }
  0x2b   : > { %v450_v55 = vadd.f32 %v449_v8, %v436_v39  ;;  %v457_v56 = vadd.f32 %v456_v9, %v443_v40  ;;  %v535_v57 = vadd.f32 %v534_v34, %v521_v41  ;;  %v562_v60 = vmul.f32 %v1538_v38, %v1790_v43 }
  0x2c   : > { %v493_v0 = vmax.f32 %v1872_v32, 0.0  ;;  %v542_v1 = vadd.f32 %v541_v35, %v528_v51  ;;  %v569_v2 = vmul.f32 %v1539_v45, %v1795_v46  ;;  %v576_v3 = vmul.f32 %v1540_v48, %v1795_v46  ;;  %v1554_v35 = vld [vmem:[%s2358_s2 + $0x14] ss:$0 sm:$0xff]  ;;  %v1556_v51 = vld [vmem:[%s2358_s2 + $0x15] ss:$0 sm:$0xff] }
  0x2d   : > { %v464_v6 = vadd.f32 %v463_v14, %v450_v55  ;;  %v471_v7 = vadd.f32 %v470_v16, %v457_v56  ;;  %v549_v8 = vadd.f32 %v548_v44, %v535_v57  ;;  %v583_v9 = vmul.f32 %v1541_v54, %v1807_v52  ;;  %v1550_v14 = vld [vmem:[%s2358_s2 + $0x12] ss:$0 sm:$0xff]  ;;  %v1555_v44 = vld [vmem:[%s2359_s3 + $0x14] ss:$0 sm:$0xff]  ;;  %v1557_v56 = vld [vmem:[%s2359_s3 + $0x15] ss:$0 sm:$0xff] }
  0x2e   : > { %v556_v12 = vadd.f32 %v555_v53, %v542_v1  ;;  %v590_v13 = vmul.f32 %v1542_v61, %v1807_v52  ;;  %v1545_v17 = vadd.f32 -2.0, %v1755_v15  ;;  %v619_v18 = vmul.f32 %v1546_v63, %v1763_v24  ;;  %v1558_v57 = vld [vmem:[%s2358_s2 + $0x16] ss:$0 sm:$0xff] }
  0x2f   : > { %v563_v16 = vadd.f32 %v562_v60, %v549_v8  ;;  %v597_v19 = vmul.f32 %v1543_v62, %v1818_v58  ;;  %v604_v20 = vmul.f32 %v1544_v4, %v1818_v58  ;;  %v626_v21 = vmul.f32 %v1547_v5, %v1763_v24  ;;  %v1559_v1 = vld [vmem:[%s2359_s3 + $0x16] ss:$0 sm:$0xff]  ;;  %v1564_v8 = vld [vmem:[%s2359_s3 + $0x18] ss:$0 sm:$0xff] }
  0x30   : > { %v570_v23 = vadd.f32 %v569_v2, %v556_v12  ;;  %v611_v25 = vand.u32 2147483647, %v1545_v17  ;;  %v633_v26 = vmul.f32 %v1548_v10, %v1777_v36  ;;  %v640_v27 = vmul.f32 %v1549_v11, %v1777_v36  ;;  %v1560_v2 = vld [vmem:[%s2358_s2 + $0x17] ss:$0 sm:$0xff]  ;;  %v1565_v12 = vld [vmem:[%s2358_s2 + $0x19] ss:$0 sm:$0xff] }
  0x31   : > { %v478_v30 = vadd.f32 %v477_v49, %v464_v6  ;;  %v485_v31 = vadd.f32 %v484_v50, %v471_v7  ;;  %v577_v33 = vadd.f32 %v576_v3, %v563_v16  ;;  %v647_v34 = vmul.f32 %v1550_v14, %v1779_v37  ;;  %v1563_v7 = vld [vmem:[%s2358_s2 + $0x18] ss:$0 sm:$0xff]  ;;  %v1561_v11 = vld [vmem:[%s2359_s3 + $0x17] ss:$0 sm:$0xff] }
  0x32   : > { %v584_v38 = vadd.f32 %v583_v9, %v570_v23  ;;  %v1942_v39 = vsub.f32 1.0, %v611_v25  ;;  %v634_v40 = vadd.f32 %v633_v26, %v619_v18  ;;  %v641_v41 = vadd.f32 %v640_v27, %v626_v21 }
  0x33   : > { %v591_v45 = vadd.f32 %v590_v13, %v577_v33  ;;  %v654_v48 = vmul.f32 %v1551_v22, %v1779_v37  ;;  %v661_v49 = vmul.f32 %v1552_v28, %v1788_v42  ;;  %v668_v50 = vmul.f32 %v1553_v29, %v1788_v42  ;;  %v1566_v13 = vld [vmem:[%s2359_s3 + $0x19] ss:$0 sm:$0xff]  ;;  %v1570_v29 = vld [vmem:[%s2359_s3 + $0x1b] ss:$0 sm:$0xff] }
  0x34   : > { %v598_v53 = vadd.f32 %v597_v19, %v584_v38  ;;  %v648_v54 = vadd.f32 %v647_v34, %v634_v40  ;;  %v675_v55 = vmul.f32 %v1554_v35, %v1790_v43  ;;  %v486_v60 = vmul.f32 %v478_v30, %v373_v59  ;;  %v1567_v19 = vld [vmem:[%s2358_s2 + $0x1a] ss:$0 sm:$0xff]  ;;  %v1571_v30 = vld [vmem:[%s2358_s2 + $0x1c] ss:$0 sm:$0xff] }
  0x35   : > { %v605_v61 = vadd.f32 %v604_v20, %v591_v45  ;;  %v655_v62 = vadd.f32 %v654_v48, %v641_v41  ;;  %v682_v63 = vmul.f32 %v1555_v44, %v1790_v43  ;;  %v488_v3 = vmul.f32 %v485_v31, %v373_v59  ;;  %v1568_v20 = vld [vmem:[%s2359_s3 + $0x1a] ss:$0 sm:$0xff]  ;;  %v1572_v38 = vld [vmem:[%s2359_s3 + $0x1c] ss:$0 sm:$0xff]  ;;  %v1573_v48 = vld [vmem:[%s2358_s2 + $0x1d] ss:$0 sm:$0xff] }
  0x36   : > { %v613_v4 = vmax.f32 %v1942_v39, 0.0  ;;  %v662_v5 = vadd.f32 %v661_v49, %v648_v54  ;;  %v689_v6 = vmul.f32 %v1556_v51, %v1795_v46  ;;  %v606_v9 = vmul.f32 %v598_v53, %v493_v0  ;;  %v1574_v54 = vld [vmem:[%s2359_s3 + $0x1d] ss:$0 sm:$0xff]  ;;  %v1585_v39 = vld [vmem:[%s2359_s3 + $0x22] ss:$0 sm:$0xff] }
  0x37   : > { %v669_v10 = vadd.f32 %v668_v50, %v655_v62  ;;  %v696_v47 = vmul.f32 %v1557_v56, %v1795_v46  ;;  %v703_v59 = vmul.f32 %v1558_v57, %v1807_v52  ;;  %v608_v17 = vmul.f32 %v605_v61, %v493_v0  ;;  %v1569_v0 = vld [vmem:[%s2358_s2 + $0x1b] ss:$0 sm:$0xff] }
  0x38   : > { %v676_v18 = vadd.f32 %v675_v55, %v662_v5  ;;  %v710_v14 = vmul.f32 %v1559_v1, %v1807_v52  ;;  %v1562_v16 = vadd.f32 -3.0, %v1755_v15  ;;  %v717_v22 = vmul.f32 %v1560_v2, %v1818_v58  ;;  %v1575_v55 = vld [vmem:[%s2358_s2 + $0x1e] ss:$0 sm:$0xff] }
  0x39   : > { %v683_v21 = vadd.f32 %v682_v63, %v669_v10  ;;  %v739_v23 = vmul.f32 %v1563_v7, %v1763_v24  ;;  %v746_v32 = vmul.f32 %v1564_v8, %v1763_v24  ;;  %v724_v26 = vmul.f32 %v1561_v11, %v1818_v58  ;;  %v1580_v7 = vld [vmem:[%s2358_s2 + $0x20] ss:$0 sm:$0xff]  ;;  %v1582_v11 = vld [vmem:[%s2358_s2 + $0x21] ss:$0 sm:$0xff] }
  0x3a   : > { %v690_v25 = vadd.f32 %v689_v6, %v676_v18  ;;  %v753_v27 = vmul.f32 %v1565_v12, %v1777_v36  ;;  %v760_v28 = vmul.f32 %v1566_v13, %v1777_v36  ;;  %v731_v33 = vand.u32 2147483647, %v1562_v16  ;;  %v1577_v6 = vld [vmem:[%s2358_s2 + $0x1f] ss:$0 sm:$0xff]  ;;  %v1584_v16 = vld [vmem:[%s2358_s2 + $0x22] ss:$0 sm:$0xff] }
  0x3b   : > { %v697_v31 = vadd.f32 %v696_v47, %v683_v21  ;;  %v767_v34 = vmul.f32 %v1567_v19, %v1779_v37  ;;  %v774_v35 = vmul.f32 %v1568_v20, %v1779_v37  ;;  %v781_v45 = vmul.f32 %v1569_v0, %v1788_v42 }
  0x3c   : > { %v704_v40 = vadd.f32 %v703_v59, %v690_v25  ;;  %v754_v41 = vadd.f32 %v753_v27, %v739_v23  ;;  %v761_v44 = vadd.f32 %v760_v28, %v746_v32  ;;  %v2026_v49 = vadd.f32 %v606_v9, %v486_v60  ;;  %v1576_v60 = vld [vmem:[%s2359_s3 + $0x1e] ss:$0 sm:$0xff]  ;;  %v1581_v59 = vld [vmem:[%s2359_s3 + $0x20] ss:$0 sm:$0xff] }
  0x3d   : > { %v711_v50 = vadd.f32 %v710_v14, %v697_v31  ;;  %v788_v51 = vmul.f32 %v1570_v29, %v1788_v42  ;;  %v795_v53 = vmul.f32 %v1571_v30, %v1790_v43  ;;  %v802_v62 = vmul.f32 %v1572_v38, %v1790_v43  ;;  %v1583_v14 = vld [vmem:[%s2359_s3 + $0x21] ss:$0 sm:$0xff]  ;;  %v1588_v31 = vld [vmem:[%s2358_s2 + $0x24] ss:$0 sm:$0xff] }
  0x3e   : > { %v718_v56 = vadd.f32 %v717_v22, %v704_v40  ;;  %v768_v57 = vadd.f32 %v767_v34, %v754_v41  ;;  %v775_v61 = vadd.f32 %v774_v35, %v761_v44  ;;  %v609_v63 = vadd.f32 %v608_v17, %v488_v3  ;;  %v1578_v3 = vld [vmem:[%s2359_s3 + $0x1f] ss:$0 sm:$0xff]  ;;  %v1589_v40 = vld [vmem:[%s2359_s3 + $0x24] ss:$0 sm:$0xff] }
  0x3f   : > { %v725_v1 = vadd.f32 %v724_v26, %v711_v50  ;;  %v2040_v2 = vsub.f32 1.0, %v731_v33  ;;  %v809_v5 = vmul.f32 %v1573_v48, %v1795_v46  ;;  %v816_v10 = vmul.f32 %v1574_v54, %v1795_v46  ;;  %v1587_v26 = vld [vmem:[%s2359_s3 + $0x23] ss:$0 sm:$0xff]  ;;  %v1590_v50 = vld [vmem:[%s2358_s2 + $0x25] ss:$0 sm:$0xff] }
  0x40   : > { %v782_v8 = vadd.f32 %v781_v45, %v768_v57  ;;  %v789_v9 = vadd.f32 %v788_v51, %v775_v61  ;;  %v823_v47 = vmul.f32 %v1575_v55, %v1807_v52  ;;  %v726_v12 = vmul.f32 %v718_v56, %v613_v4  ;;  %v1591_v55 = vld [vmem:[%s2359_s3 + $0x25] ss:$0 sm:$0xff]  ;;  %v1592_v56 = vld [vmem:[%s2358_s2 + $0x26] ss:$0 sm:$0xff] }
  0x41   : > { %v728_v13 = vmul.f32 %v725_v1, %v613_v4  ;;  %v830_v17 = vmul.f32 %v1576_v60, %v1807_v52  ;;  %v1579_v18 = vadd.f32 -4.0, %v1755_v15  ;;  %v837_v21 = vmul.f32 %v1577_v6, %v1818_v58  ;;  %v1586_v4 = vld [vmem:[%s2358_s2 + $0x23] ss:$0 sm:$0xff]  ;;  %v1593_v1 = vld [vmem:[%s2359_s3 + $0x26] ss:$0 sm:$0xff] }
  0x42   : > { %v796_v19 = vadd.f32 %v795_v53, %v782_v8  ;;  %v803_v20 = vadd.f32 %v802_v62, %v789_v9  ;;  %v859_v22 = vmul.f32 %v1580_v7, %v1763_v24  ;;  %v844_v23 = vmul.f32 %v1578_v3, %v1818_v58  ;;  %v1594_v9 = vld [vmem:[%s2358_s2 + $0x27] ss:$0 sm:$0xff] }
  0x43   : > { %v851_v32 = vand.u32 2147483647, %v1579_v18  ;;  %v866_v0 = vmul.f32 %v1581_v59, %v1763_v24  ;;  %v873_v25 = vmul.f32 %v1582_v11, %v1777_v36  ;;  %v880_v29 = vmul.f32 %v1583_v14, %v1777_v36  ;;  %v1595_v18 = vld [vmem:[%s2359_s3 + $0x27] ss:$0 sm:$0xff] }
  0x44   : > { %v810_v27 = vadd.f32 %v809_v5, %v796_v19  ;;  %v817_v28 = vadd.f32 %v816_v10, %v803_v20  ;;  %v887_v30 = vmul.f32 %v1584_v16, %v1779_v37  ;;  %v894_v35 = vmul.f32 %v1585_v39, %v1779_v37  ;;  %v1598_v10 = vld [vmem:[%s2359_s3 + $0x28] ss:$0 sm:$0xff]  ;;  %v1601_v16 = vld [vmem:[%s2358_s2 + $0x2a] ss:$0 sm:$0xff] }
  0x45   : > { %v2091_v33 = vsub.f32 1.0, %v851_v32  ;;  %v874_v34 = vadd.f32 %v873_v25, %v859_v22  ;;  %v901_v38 = vmul.f32 %v1586_v4, %v1788_v42  ;;  %v881_v45 = vadd.f32 %v880_v29, %v866_v0  ;;  %v1602_v19 = vld [vmem:[%s2359_s3 + $0x2a] ss:$0 sm:$0xff]  ;;  %v1603_v4 = vld [vmem:[%s2358_s2 + $0x2b] ss:$0 sm:$0xff] }
  0x46   : > { %v824_v41 = vadd.f32 %v823_v47, %v810_v27  ;;  %v831_v44 = vadd.f32 %v830_v17, %v817_v28  ;;  %v908_v48 = vmul.f32 %v1587_v26, %v1788_v42  ;;  %v733_v51 = vmax.f32 %v2040_v2, 0.0  ;;  %v1597_v2 = vld [vmem:[%s2358_s2 + $0x28] ss:$0 sm:$0xff]  ;;  %v1604_v26 = vld [vmem:[%s2359_s3 + $0x2b] ss:$0 sm:$0xff] }
  0x47   : > { %v888_v53 = vadd.f32 %v887_v30, %v874_v34  ;;  %v915_v54 = vmul.f32 %v1588_v31, %v1790_v43  ;;  %v895_v62 = vadd.f32 %v894_v35, %v881_v45  ;;  %v922_v60 = vmul.f32 %v1589_v40, %v1790_v43  ;;  %v1605_v27 = vld [vmem:[%s2358_s2 + $0x2c] ss:$0 sm:$0xff] }
  0x48   : > { %v838_v57 = vadd.f32 %v837_v21, %v824_v41  ;;  %v845_v61 = vadd.f32 %v844_v23, %v831_v44  ;;  %v727_v5 = vadd.f32 %v726_v12, %v2026_v49  ;;  %v729_v6 = vadd.f32 %v728_v13, %v609_v63  ;;  %v1599_v49 = vld [vmem:[%s2358_s2 + $0x29] ss:$0 sm:$0xff]  ;;  %v1606_v34 = vld [vmem:[%s2359_s3 + $0x2c] ss:$0 sm:$0xff] }
  0x49   : > { %v902_v7 = vadd.f32 %v901_v38, %v888_v53  ;;  %v929_v8 = vmul.f32 %v1590_v50, %v1795_v46  ;;  %v853_v47 = vmax.f32 %v2091_v33, 0.0  ;;  %v909_v3 = vadd.f32 %v908_v48, %v895_v62  ;;  %v1600_v63 = vld [vmem:[%s2359_s3 + $0x29] ss:$0 sm:$0xff]  ;;  %v1608_v53 = vld [vmem:[%s2359_s3 + $0x2d] ss:$0 sm:$0xff] }
  0x4a   : > { %v936_v59 = vmul.f32 %v1591_v55, %v1795_v46  ;;  %v943_v11 = vmul.f32 %v1592_v56, %v1807_v52  ;;  %v846_v12 = vmul.f32 %v838_v57, %v733_v51  ;;  %v950_v17 = vmul.f32 %v1593_v1, %v1807_v52  ;;  %v1610_v1 = vld [vmem:[%s2359_s3 + $0x2e] ss:$0 sm:$0xff] }
  0x4b   : > { %v916_v13 = vadd.f32 %v915_v54, %v902_v7  ;;  %v979_v14 = vmul.f32 %v1597_v2, %v1763_v24  ;;  %v848_v20 = vmul.f32 %v845_v61, %v733_v51  ;;  %v923_v21 = vadd.f32 %v922_v60, %v909_v3  ;;  %v1607_v51 = vld [vmem:[%s2358_s2 + $0x2d] ss:$0 sm:$0xff]  ;;  %v1609_v61 = vld [vmem:[%s2358_s2 + $0x2e] ss:$0 sm:$0xff]  ;;  %v1614_v2 = vld [vmem:[%s2358_s2 + $0x30] ss:$0 sm:$0xff] }
  0x4c   : > { %v1596_v22 = vadd.f32 -5.0, %v1755_v15  ;;  %v986_v39 = vmul.f32 %v1598_v10, %v1763_v24  ;;  %v957_v32 = vmul.f32 %v1594_v9, %v1818_v58  ;;  %v993_v0 = vmul.f32 %v1599_v49, %v1777_v36  ;;  %v1611_v3 = vld [vmem:[%s2358_s2 + $0x2f] ss:$0 sm:$0xff] }
  0x4d   : > { %v930_v23 = vadd.f32 %v929_v8, %v916_v13  ;;  %v1000_v25 = vmul.f32 %v1600_v63, %v1777_v36  ;;  %v937_v28 = vadd.f32 %v936_v59, %v923_v21  ;;  %v964_v29 = vmul.f32 %v1595_v18, %v1818_v58  ;;  %v1616_v59 = vld [vmem:[%s2358_s2 + $0x31] ss:$0 sm:$0xff] }
  0x4e   : > { %v1007_v30 = vmul.f32 %v1601_v16, %v1779_v37  ;;  %v1014_v31 = vmul.f32 %v1602_v19, %v1779_v37  ;;  %v994_v38 = vadd.f32 %v993_v0, %v979_v14  ;;  %v1021_v41 = vmul.f32 %v1603_v4, %v1788_v42  ;;  %v1617_v13 = vld [vmem:[%s2359_s3 + $0x31] ss:$0 sm:$0xff]  ;;  %v1619_v19 = vld [vmem:[%s2359_s3 + $0x32] ss:$0 sm:$0xff] }
  0x4f   : > { %v944_v35 = vadd.f32 %v943_v11, %v930_v23  ;;  %v1001_v40 = vadd.f32 %v1000_v25, %v986_v39  ;;  %v951_v44 = vadd.f32 %v950_v17, %v937_v28  ;;  %v971_v45 = vand.u32 2147483647, %v1596_v22  ;;  %v1618_v17 = vld [vmem:[%s2358_s2 + $0x32] ss:$0 sm:$0xff]  ;;  %v1621_v23 = vld [vmem:[%s2359_s3 + $0x33] ss:$0 sm:$0xff] }
  0x50   : > { %v1028_v48 = vmul.f32 %v1604_v26, %v1788_v42  ;;  %v1035_v50 = vmul.f32 %v1605_v27, %v1790_v43  ;;  %v1008_v55 = vadd.f32 %v1007_v30, %v994_v38  ;;  %v1042_v57 = vmul.f32 %v1606_v34, %v1790_v43  ;;  %v1612_v25 = vld [vmem:[%s2359_s3 + $0x2f] ss:$0 sm:$0xff] }
  0x51   : > { %v958_v54 = vadd.f32 %v957_v32, %v944_v35  ;;  %v1015_v56 = vadd.f32 %v1014_v31, %v1001_v40  ;;  %v847_v62 = vadd.f32 %v846_v12, %v727_v5  ;;  %v965_v60 = vadd.f32 %v964_v29, %v951_v44  ;;  %v1615_v5 = vld [vmem:[%s2359_s3 + $0x30] ss:$0 sm:$0xff]  ;;  %v1623_v31 = vld [vmem:[%s2359_s3 + $0x34] ss:$0 sm:$0xff] }
  0x52   : > { %v1022_v7 = vadd.f32 %v1021_v41, %v1008_v55  ;;  %v1049_v9 = vmul.f32 %v1607_v51, %v1795_v46  ;;  %v1056_v10 = vmul.f32 %v1608_v53, %v1795_v46  ;;  %v849_v11 = vadd.f32 %v848_v20, %v729_v6  ;;  %v1620_v20 = vld [vmem:[%s2358_s2 + $0x33] ss:$0 sm:$0xff]  ;;  %v1624_v41 = vld [vmem:[%s2358_s2 + $0x35] ss:$0 sm:$0xff] }
  0x53   : > { %v1029_v8 = vadd.f32 %v1028_v48, %v1015_v56  ;;  %v966_v49 = vmul.f32 %v958_v54, %v853_v47  ;;  %v2197_v63 = vsub.f32 1.0, %v971_v45  ;;  %v1063_v12 = vmul.f32 %v1609_v61, %v1807_v52  ;;  %v1625_v51 = vld [vmem:[%s2359_s3 + $0x35] ss:$0 sm:$0xff]  ;;  %v1626_v56 = vld [vmem:[%s2358_s2 + $0x36] ss:$0 sm:$0xff] }
  0x54   : > { %v1036_v18 = vadd.f32 %v1035_v50, %v1022_v7  ;;  %v1613_v16 = vadd.f32 -6.0, %v1755_v15  ;;  %v1099_v6 = vmul.f32 %v1614_v2, %v1763_v24  ;;  %v968_v21 = vmul.f32 %v965_v60, %v853_v47  ;;  %v1622_v47 = vld [vmem:[%s2358_s2 + $0x34] ss:$0 sm:$0xff]  ;;  %v1627_v7 = vld [vmem:[%s2359_s3 + $0x36] ss:$0 sm:$0xff] }
  0x55   : > { %v1043_v14 = vadd.f32 %v1042_v57, %v1029_v8  ;;  %v1070_v22 = vmul.f32 %v1610_v1, %v1807_v52  ;;  %v1106_v39 = vmul.f32 %v1615_v5, %v1763_v24  ;;  %v1113_v4 = vmul.f32 %v1616_v59, %v1777_v36  ;;  %v1631_v57 = vld [vmem:[%s2358_s2 + $0x38] ss:$0 sm:$0xff]  ;;  %v1628_v8 = vld [vmem:[%s2358_s2 + $0x37] ss:$0 sm:$0xff]  ;;  %v1633_v59 = vld [vmem:[%s2358_s2 + $0x39] ss:$0 sm:$0xff] }
  0x56   : > { %v1050_v32 = vadd.f32 %v1049_v9, %v1036_v18  ;;  %v1120_v26 = vmul.f32 %v1617_v13, %v1777_v36  ;;  %v1127_v33 = vmul.f32 %v1618_v17, %v1779_v37  ;;  %v1077_v27 = vmul.f32 %v1611_v3, %v1818_v58  ;;  %v1632_v9 = vld [vmem:[%s2359_s3 + $0x38] ss:$0 sm:$0xff]  ;;  %v1629_v13 = vld [vmem:[%s2359_s3 + $0x37] ss:$0 sm:$0xff]  ;;  %v1635_v18 = vld [vmem:[%s2358_s2 + $0x3a] ss:$0 sm:$0xff] }
  0x57   : > { %v1057_v0 = vadd.f32 %v1056_v10, %v1043_v14  ;;  %v1114_v28 = vadd.f32 %v1113_v4, %v1099_v6  ;;  %v1134_v29 = vmul.f32 %v1619_v19, %v1779_v37  ;;  %v1141_v30 = vmul.f32 %v1620_v20, %v1788_v42  ;;  %v1636_v14 = vld [vmem:[%s2359_s3 + $0x3a] ss:$0 sm:$0xff] }
  0x58   : > { %v1064_v34 = vadd.f32 %v1063_v12, %v1050_v32  ;;  %v1091_v35 = vand.u32 2147483647, %v1613_v16  ;;  %v1121_v38 = vadd.f32 %v1120_v26, %v1106_v39  ;;  %v1148_v40 = vmul.f32 %v1621_v23, %v1788_v42  ;;  %v1638_v32 = vld [vmem:[%s2359_s3 + $0x3b] ss:$0 sm:$0xff]  ;;  %v1639_v26 = vld [vmem:[%s2358_s2 + $0x3c] ss:$0 sm:$0xff] }
  0x59   : > { %v1071_v44 = vadd.f32 %v1070_v22, %v1057_v0  ;;  %v1084_v45 = vmul.f32 %v1612_v25, %v1818_v58  ;;  %v1128_v48 = vadd.f32 %v1127_v33, %v1114_v28  ;;  %v1155_v50 = vmul.f32 %v1622_v47, %v1790_v43  ;;  %v1640_v33 = vld [vmem:[%s2359_s3 + $0x3c] ss:$0 sm:$0xff] }
  0x5a   : > { %v973_v53 = vmax.f32 %v2197_v63, 0.0  ;;  %v1135_v54 = vadd.f32 %v1134_v29, %v1121_v38  ;;  %v1162_v55 = vmul.f32 %v1623_v31, %v1790_v43  ;;  %v2253_v61 = vadd.f32 %v966_v49, %v847_v62  ;;  %v1641_v29 = vld [vmem:[%s2358_s2 + $0x3d] ss:$0 sm:$0xff] }
  0x5b   : > { %v2255_v60 = vadd.f32 %v968_v21, %v849_v11  ;;  %v1142_v1 = vadd.f32 %v1141_v30, %v1128_v48  ;;  %v1169_v2 = vmul.f32 %v1624_v41, %v1795_v46  ;;  %v1078_v10 = vadd.f32 %v1077_v27, %v1064_v34  ;;  %v1634_v11 = vld [vmem:[%s2359_s3 + $0x39] ss:$0 sm:$0xff]  ;;  %v1637_v21 = vld [vmem:[%s2358_s2 + $0x3b] ss:$0 sm:$0xff] }
  0x5c   : > { %v2267_v62 = vsub.f32 1.0, %v1091_v35  ;;  %v1149_v3 = vadd.f32 %v1148_v40, %v1135_v54  ;;  %v1176_v5 = vmul.f32 %v1625_v51, %v1795_v46  ;;  %v1085_v49 = vadd.f32 %v1084_v45, %v1071_v44  ;;  %v1642_v35 = vld [vmem:[%s2359_s3 + $0x3d] ss:$0 sm:$0xff]  ;;  %v1643_v54 = vld [vmem:[%s2358_s2 + $0x3e] ss:$0 sm:$0xff] }
  0x5d   : > { %v1156_v63 = vadd.f32 %v1155_v50, %v1142_v1  ;;  %v1183_v12 = vmul.f32 %v1626_v56, %v1807_v52  ;;  %v1219_v17 = vmul.f32 %v1631_v57, %v1763_v24  ;;  %v1190_v6 = vmul.f32 %v1627_v7, %v1807_v52 }
  0x5e   : > { %v1163_v16 = vadd.f32 %v1162_v55, %v1149_v3  ;;  %v1630_v19 = vadd.f32 -7.0, %v1755_v15  ;;  %v1226_v20 = vmul.f32 %v1632_v9, %v1763_v24  ;;  %v1197_v39 = vmul.f32 %v1628_v8, %v1818_v58 }
  0x5f   : > { %v1170_v22 = vadd.f32 %v1169_v2, %v1156_v63  ;;  %v1233_v4 = vmul.f32 %v1633_v59, %v1777_v36  ;;  %v1240_v23 = vmul.f32 %v1634_v11, %v1777_v36  ;;  %v1204_v15 = vmul.f32 %v1629_v13, %v1818_v58 }
  0x60   : > { %v1177_v0 = vadd.f32 %v1176_v5, %v1163_v16  ;;  %v1247_v24 = vmul.f32 %v1635_v18, %v1779_v37  ;;  %v1254_v25 = vmul.f32 %v1636_v14, %v1779_v37  ;;  %v1261_v28 = vmul.f32 %v1637_v21, %v1788_v42 }
  0x61   : > { %v1184_v36 = vadd.f32 %v1183_v12, %v1170_v22  ;;  %v1234_v47 = vadd.f32 %v1233_v4, %v1219_v17  ;;  %v1241_v27 = vadd.f32 %v1240_v23, %v1226_v20  ;;  %v1093_v30 = vmax.f32 %v2267_v62, 0.0 }
  0x62   : > { %v1191_v37 = vadd.f32 %v1190_v6, %v1177_v0  ;;  %v1211_v31 = vand.u32 2147483647, %v1630_v19  ;;  %v1268_v34 = vmul.f32 %v1638_v32, %v1788_v42  ;;  %v1275_v41 = vmul.f32 %v1639_v26, %v1790_v43  ;;  %v1644_v42 = vld [vmem:[%s2359_s3 + $0x3e] ss:$0 sm:$0xff] }
  0x63   : > { %v1248_v38 = vadd.f32 %v1247_v24, %v1234_v47  ;;  %v1255_v40 = vadd.f32 %v1254_v25, %v1241_v27  ;;  %v1282_v44 = vmul.f32 %v1640_v33, %v1790_v43  ;;  %v1086_v45 = vmul.f32 %v1078_v10, %v973_v53  ;;  %v1645_v43 = vld [vmem:[%s2358_s2 + $0x3f] ss:$0 sm:$0xff] }
  0x64   : > { %v1088_v48 = vmul.f32 %v1085_v49, %v973_v53  ;;  %v1198_v50 = vadd.f32 %v1197_v39, %v1184_v36  ;;  %v1205_v51 = vadd.f32 %v1204_v15, %v1191_v37  ;;  %v1289_v57 = vmul.f32 %v1641_v29, %v1795_v46  ;;  %v1646_v53 = vld [vmem:[%s2359_s3 + $0x3f] ss:$0 sm:$0xff] }
  0x65   : > { %v1262_v55 = vadd.f32 %v1261_v28, %v1248_v38  ;;  %v1269_v56 = vadd.f32 %v1268_v34, %v1255_v40  ;;  %v1296_v1 = vmul.f32 %v1642_v35, %v1795_v46  ;;  %v1212_v2 = vsub.f32 1.0, %v1211_v31 }
  0x66   : > { %v1303_v9 = vmul.f32 %v1643_v54, %v1807_v52  ;;  %v1310_v10 = vmul.f32 %v1644_v42, %v1807_v52  ;;  %v1087_v62 = vadd.f32 %v1086_v45, %v2253_v61  ;;  %v1089_v3 = vadd.f32 %v1088_v48, %v2255_v60 }
  0x67   : > { %v1276_v7 = vadd.f32 %v1275_v41, %v1262_v55  ;;  %v1283_v8 = vadd.f32 %v1282_v44, %v1269_v56  ;;  %v1206_v46 = vmul.f32 %v1198_v50, %v1093_v30  ;;  %v1208_v5 = vmul.f32 %v1205_v51, %v1093_v30 }
  0x68   : > { %v1317_v49 = vmul.f32 %v1645_v43, %v1818_v58  ;;  %v1324_v63 = vmul.f32 %v1646_v53, %v1818_v58  ;;  %v1213_v12 = vmax.f32 %v1212_v2, 0.0 }
  0x69   : > { %v1290_v59 = vadd.f32 %v1289_v57, %v1276_v7  ;;  %v1297_v11 = vadd.f32 %v1296_v1, %v1283_v8  ;;  %v1207_v18 = vadd.f32 %v1206_v46, %v1087_v62  ;;  %v1209_v14 = vadd.f32 %v1208_v5, %v1089_v3 }
  0x6b   : > { %v1304_v13 = vadd.f32 %v1303_v9, %v1290_v59  ;;  %v1311_v17 = vadd.f32 %v1310_v10, %v1297_v11 }
  0x6d   : > { %v1318_v52 = vadd.f32 %v1317_v49, %v1304_v13  ;;  %v1325_v16 = vadd.f32 %v1324_v63, %v1311_v17 }
  0x6f   : > { %v1326_v61 = vmul.f32 %v1318_v52, %v1213_v12  ;;  %v1328_v6 = vmul.f32 %v1325_v16, %v1213_v12 }
  0x71   : > { %v1327_v60 = vadd.f32 %v1326_v61, %v1207_v18  ;;  %v1329_v58 = vadd.f32 %v1328_v6, %v1209_v14 }
  0x73   : > { %1331 = vst.msk [vmem:[%s324_s10] sm:$0xff] %vm1330_vm0, %v1327_v60  ;;  %1332 = vst.msk [vmem:[%s331_s13] sm:$0xff] %vm1330_vm0, %v1329_v58 }
  0x74 PF: > { %s16_s20 = sadd.s32 1, %s1695_s20   ;;  %s2362_s18 = smov %s1691_s19 }
  0x75   : > { %p13_p5 = scmp.ge.s32.totalorder %s16_s20, 6   ;;  %s2363_s19 = smov %s2365_s21 }
  0x77   :  { %15 = sbr.rel (!%p13_p5) target bundleno = 2 (0x2), region = 87 }

</bundles_post_ra>
